<compile_context>
chip_gen: v6e
topology: v6e:2x2x1
jax: 0.10.0
libtpu: 0.0.40
codegen_flags: <defaults>
</compile_context>

<pallas_src>
import functools

import jax
import jax.numpy as jnp
from jax import lax
from jax.experimental import pallas as pl
from jax.experimental.pallas import tpu as pltpu


def _cdiv(a, b):
    return -(-a // b)


def _round_up(v, m):
    return _cdiv(v, m) * m


def _plan_tiles(B, L, itemsize, block_budget):
    """Pick (TB, TL, grid_b, grid_l) targeting ~block_budget bytes per block."""
    row_bytes = L * itemsize
    min_rows = B if B < 8 else 8

    if min_rows * row_bytes <= block_budget:
        # ---- fast path: whole rows fit in one block (TL = L, no reduction axis) ----
        if B <= min_rows:
            return min_rows, L, 1, 1
        max_tb = min(1024, max(8, (block_budget // row_bytes) // 8 * 8))
        # >= 2 B tiles when B allows, so both v7x TensorCores get work.
        grid_b = max(_cdiv(B, max_tb), 2 if B > 8 else 1)
        tb = min(max_tb, _round_up(_cdiv(B, grid_b), 8))
        return tb, L, _cdiv(B, tb), 1

    # ---- tiled path: rows too long; tile L by bytes (lane-multiple) ----
    tb = min_rows
    tl = (block_budget // (tb * itemsize)) // 128 * 128
    tl = max(128, min(tl, _round_up(L, 128)))
    return tb, tl, _cdiv(B, tb), _cdiv(L, tl)


def _vmem_limit(in_block_bytes, out_block_bytes, scratch_bytes):
    need = 2 * in_block_bytes + 2 * out_block_bytes + scratch_bytes
    return int(min(max(2 * need + (4 << 20), 16 << 20), 48 << 20))


def _mean_single_kernel(x_ref, o_ref, *, inv_l):
    # x_ref: (TB, L) — whole row per block; one reduce + scale, no scratch.
    x = x_ref[...].astype(jnp.float32)
    s = jnp.sum(x, axis=-1, keepdims=True)
    o_ref[...] = (s * jnp.float32(inv_l)).astype(o_ref.dtype)


def _mean_tiled_kernel(x_ref, o_ref, acc_ref, *, l_total, tl, num_l):
    # x_ref : (TB, TL) input tile            (TL is a multiple of 128)
    # o_ref : (TB, 1)  output block (resident across the L grid axis)
    # acc_ref: (TB, 128) lane-dense f32 running-sum scratch (VPU adds only)
    lt = pl.program_id(1)
    last = num_l - 1
    n_chunks = tl // 128
    rem = l_total - last * tl  # valid columns in the last L tile (static)

    @pl.when(lt == 0)
    def _init():
        acc_ref[...] = jnp.zeros_like(acc_ref)

    if rem == tl:
        # L divides evenly into TL: every tile is full, no masking anywhere.
        for c in range(n_chunks):
            acc_ref[...] += x_ref[:, c * 128:(c + 1) * 128].astype(jnp.float32)
    else:
        @pl.when(lt != last)
        def _full_tiles():
            for c in range(n_chunks):
                acc_ref[...] += x_ref[:, c * 128:(c + 1) * 128].astype(jnp.float32)

        @pl.when(lt == last)
        def _tail_tile():
            # Only the ragged last tile pays for masking, and only its one
            # partial 128-lane chunk; fully-OOB chunks are skipped statically.
            for c in range(n_chunks):
                start = c * 128
                if start >= rem:
                    break
                xc = x_ref[:, start:start + 128].astype(jnp.float32)
                if start + 128 > rem:
                    col = start + lax.broadcasted_iota(jnp.int32, (1, 128), 1)
                    xc = jnp.where(col < rem, xc, 0.0)
                acc_ref[...] += xc

    @pl.when(lt == last)
    def _finalize():
        s = jnp.sum(acc_ref[...], axis=-1, keepdims=True)  # one XLU reduce
        o_ref[...] = (s * jnp.float32(1.0 / l_total)).astype(o_ref.dtype)


def global_avg_pool(x, *, block_budget_bytes=4 * 1024 * 1024):
    """Mean over the last axis of x (any rank >= 1), Pallas TPU kernel."""
    orig_shape = x.shape
    L = orig_shape[-1]
    lead = orig_shape[:-1]
    B = 1
    for d in lead:
        B *= d
    x2 = x.reshape(B, L)

    itemsize = jnp.dtype(x.dtype).itemsize
    TB, TL, grid_b, grid_l = _plan_tiles(B, L, itemsize, block_budget_bytes)

    in_block_bytes = TB * TL * itemsize
    out_block_bytes = TB * itemsize

    if grid_l == 1 and TL == L:
        # ---------------- fast path: one reduction step per B tile ----------------
        out = pl.pallas_call(
            functools.partial(_mean_single_kernel, inv_l=1.0 / L),
            out_shape=jax.ShapeDtypeStruct((B, 1), x.dtype),
            grid=(grid_b,),
            in_specs=[pl.BlockSpec((TB, L), lambda b: (b, 0))],
            out_specs=pl.BlockSpec((TB, 1), lambda b: (b, 0)),
            compiler_params=pltpu.CompilerParams(
                dimension_semantics=("parallel",),
                vmem_limit_bytes=_vmem_limit(in_block_bytes, out_block_bytes, 0)),
        )(x2)
    else:
        # ---------------- tiled path: accumulate across the L grid axis ----------------
        scratch_bytes = TB * 128 * 4
        out = pl.pallas_call(
            functools.partial(_mean_tiled_kernel, l_total=L, tl=TL, num_l=grid_l),
            out_shape=jax.ShapeDtypeStruct((B, 1), x.dtype),
            grid=(grid_b, grid_l),
            in_specs=[pl.BlockSpec((TB, TL), lambda b, l: (b, l))],
            out_specs=pl.BlockSpec((TB, 1), lambda b, l: (b, 0)),
            scratch_shapes=[pltpu.VMEM((TB, 128), jnp.float32)],
            compiler_params=pltpu.CompilerParams(
                dimension_semantics=("parallel", "arbitrary"),
                vmem_limit_bytes=_vmem_limit(in_block_bytes, out_block_bytes,
                                             scratch_bytes)),
        )(x2)

    return out.reshape(lead)


if __name__ == "__main__":
    keys = jax.random.split(jax.random.PRNGKey(0), 3)

    # Shape GlobalAvgPool sees inside FCN: (batch, channels, length).
    x = jax.random.normal(keys[0], (2, 128, 5000), dtype=jnp.float32)
    out = jax.block_until_ready(global_avg_pool(x))
    ref = jnp.mean(x, axis=-1)
    assert out.shape == (2, 128), out.shape
    assert out.dtype == jnp.float32
    assert bool(jnp.all(jnp.isfinite(out)))
    assert bool(jnp.allclose(out, ref, rtol=1e-5, atol=1e-5)), (
        float(jnp.max(jnp.abs(out - ref))))

    # Exercise the tiled (long-row) path by forcing a small block budget:
    # B=8, L=5000 -> TL=2048, 3 L-steps, ragged masked tail.
    x2 = jax.random.normal(keys[1], (2, 4, 5000), dtype=jnp.float32)
    out2 = jax.block_until_ready(
        global_avg_pool(x2, block_budget_bytes=64 * 1024))
    ref2 = jnp.mean(x2, axis=-1)
    assert out2.shape == (2, 4), out2.shape
    assert bool(jnp.allclose(out2, ref2, rtol=1e-5, atol=1e-5)), (
        float(jnp.max(jnp.abs(out2 - ref2))))

    # Ragged B (B=10, not a multiple of 8): relies on cdiv grid + write clipping.
    x3 = jax.random.normal(keys[2], (2, 5, 300), dtype=jnp.float32)
    out3 = jax.block_until_ready(global_avg_pool(x3))
    ref3 = jnp.mean(x3, axis=-1)
    assert out3.shape == (2, 5), out3.shape
    assert bool(jnp.allclose(out3, ref3, rtol=1e-5, atol=1e-5)), (
        float(jnp.max(jnp.abs(out3 - ref3))))

    print("KERNEL_OK")
</pallas_src>

<mosaic_0001>
module attributes {stable_mosaic.version = 11 : i64} {
  func.func @_mean_single_kernel(%arg0: i32, %arg1: memref<128x5000xf32, #tpu.memory_space<vmem>>, %arg2: memref<128x1xf32, #tpu.memory_space<vmem>>) attributes {dimension_semantics = [#tpu.dimension_semantics<parallel>], iteration_bounds = array<i64: 2>, scalar_prefetch = 0 : i64, scratch_operands = 0 : i64, tpu.core_type = #tpu.core_type<tc>, window_params = [{transform_indices = @transform_0, window_bounds = array<i64: 128, 5000>}, {transform_indices = @transform_1, window_bounds = array<i64: 128, 1>}]} {
    %c0 = arith.constant 0 : index
    %c0_0 = arith.constant 0 : index
    %0 = vector.load %arg1[%c0, %c0_0] : memref<128x5000xf32, #tpu.memory_space<vmem>>, vector<128x5000xf32>
    %cst = arith.constant dense<0.000000e+00> : vector<128xf32>
    %1 = vector.multi_reduction <add>, %0, %cst [1] : vector<128x5000xf32> to vector<128xf32>
    %2 = vector.shape_cast %1 : vector<128xf32> to vector<128x1xf32>
    %cst_1 = arith.constant 2.000000e-04 : f32
    %3 = vector.broadcast %cst_1 : f32 to vector<128x1xf32>
    %4 = arith.mulf %2, %3 : vector<128x1xf32>
    %c0_2 = arith.constant 0 : index
    %c0_3 = arith.constant 0 : index
    %5 = vector.load %arg2[%c0_2, %c0_3] : memref<128x1xf32, #tpu.memory_space<vmem>>, vector<128x1xf32>
    tpu.vector_store %arg2[%c0_2, %c0_3], %4 {strides = array<i32>} : memref<128x1xf32, #tpu.memory_space<vmem>>, vector<128x1xf32>,
    return
  }
  func.func @transform_0(%arg0: i32) -> (i32, i32) {
    %c0_i32 = arith.constant 0 : i32
    %c0_i32_0 = arith.constant 0 : i32
    return %arg0, %c0_i32 : i32, i32
  }
  func.func @transform_1(%arg0: i32) -> (i32, i32) {
    %c0_i32 = arith.constant 0 : i32
    %c0_i32_0 = arith.constant 0 : i32
    return %arg0, %c0_i32 : i32, i32
  }
}

</mosaic_0001>

<bundles_post_ra>
// kernel: tpu_custom_call.1
= control target key start
LH: loop header
LB: loop body
LE: loop exit
PB: predicated region body
PF: predicated region fallthrough
CT: control target
= control target key end

     0   :  { %s1563_s6 = smov 0   ;;  %s2276_s0 = inlined_call_operand.vmem [shape: f32[256,5000], index: 0, kind: input, shape index: {}]   ;;  %s2277_s1 = inlined_call_operand.vmem [shape: f32[256,1], index: 1, kind: output, shape index: {}]  }
   0x1 LB: > { %s1525_s7 = sadd.s32 4294967295, %s1551_s6   ;;  %p1529_p0 = scmp.ge.s32.totalorder %s1551_s6, 1  ;;  %s1551_s6 = sphi %s1563_s6, %s11_s6  }
   0x2   : > { %p89_p1 = scmp.lt.s32.totalorder %s1551_s6, 3 }
   0x4   : > { %p90_p2 = pnand %p1529_p0, %p89_p1 }
   0x5   : > { %s1530_s8 = sshll.u32 (!%p90_p2), %s1525_s7, 4 }
   0x6   : > { %93 = sbr.rel (%p90_p2) target bundleno = 421 (0x1a5), region = 24  ;;  %p111_p3 = scmp.lt.s32.totalorder (!%p90_p2), %s1530_s8, 31 }
   0xb   : > { %s2279_s8 = smov (!%p111_p3, %s1530_s8), 31  ;;  %vm801_vm0 = vcmask 64512   ;;  %vm1452_vm1 = vcmask 7168  }
   0xc   : > { %s1536_s9 = smul.u32 320, %s2279_s8  ;;  %s1533_s13 = sshll.u32 %s2279_s8, 3 }
   0xd   : > { %s2154_s16 = scalar_lea.vmem %s2277_s1, %s1533_s13 }
   0xe   : > { %s1577_s12 = scalar_lea.vmem %s2276_s0, %s1536_s9 }
   0xf   : > { %v203_v0 = vld [vmem:[%s1577_s12 + $0x280] sm:$0xff]  ;;  %v204_v1 = vld [vmem:[%s1577_s12 + $0x288] sm:$0xff]  ;;  %v205_v2 = vld [vmem:[%s1577_s12 + $0x290] sm:$0xff] }
  0x10   : > { %v848_v3 = vadd.f32 %v204_v1, %v203_v0  ;;  %v206_v4 = vld [vmem:[%s1577_s12 + $0x298] sm:$0xff]  ;;  %v207_v6 = vld [vmem:[%s1577_s12 + $0x2a0] sm:$0xff]  ;;  %v208_v8 = vld [vmem:[%s1577_s12 + $0x2a8] sm:$0xff] }
  0x11   : > { %v209_v10 = vld [vmem:[%s1577_s12 + $0x2b0] sm:$0xff]  ;;  %v210_v12 = vld [vmem:[%s1577_s12 + $0x2b8] sm:$0xff]  ;;  %v211_v14 = vld [vmem:[%s1577_s12 + $0x2c0] sm:$0xff] }
  0x12   : > { %v849_v5 = vadd.f32 %v848_v3, %v205_v2  ;;  %v123_v16 = vld [vmem:[%s1577_s12] sm:$0xff]  ;;  %v124_v17 = vld [vmem:[%s1577_s12 + $0x8] sm:$0xff]  ;;  %v125_v19 = vld [vmem:[%s1577_s12 + $0x10] sm:$0xff] }
  0x13   : > { %v212_v18 = vld [vmem:[%s1577_s12 + $0x2c8] sm:$0xff]  ;;  %v763_v20 = vadd.f32 %v124_v17, %v123_v16  ;;  %v126_v22 = vld [vmem:[%s1577_s12 + $0x18] sm:$0xff]  ;;  %v213_v23 = vld [vmem:[%s1577_s12 + $0x2d0] sm:$0xff] }
  0x14   : > { %v850_v7 = vadd.f32 %v849_v5, %v206_v4  ;;  %v127_v26 = vld [vmem:[%s1577_s12 + $0x20] sm:$0xff]  ;;  %v214_v27 = vld [vmem:[%s1577_s12 + $0x2d8] sm:$0xff]  ;;  %v128_v30 = vld [vmem:[%s1577_s12 + $0x28] sm:$0xff] }
  0x15   : > { %v764_v24 = vadd.f32 %v763_v20, %v125_v19  ;;  %v215_v31 = vld [vmem:[%s1577_s12 + $0x2e0] sm:$0xff]  ;;  %v129_v34 = vld [vmem:[%s1577_s12 + $0x30] sm:$0xff]  ;;  %v216_v35 = vld [vmem:[%s1577_s12 + $0x2e8] sm:$0xff] }
  0x16   : > { %v851_v9 = vadd.f32 %v850_v7, %v207_v6  ;;  %v130_v38 = vld [vmem:[%s1577_s12 + $0x38] sm:$0xff]  ;;  %v217_v39 = vld [vmem:[%s1577_s12 + $0x2f0] sm:$0xff]  ;;  %v131_v42 = vld [vmem:[%s1577_s12 + $0x40] sm:$0xff] }
  0x17   : > { %v765_v28 = vadd.f32 %v764_v24, %v126_v22  ;;  %v218_v43 = vld [vmem:[%s1577_s12 + $0x2f8] sm:$0xff]  ;;  %v243_v45 = vld [vmem:[%s1577_s12 + $0x3c0] sm:$0xff]  ;;  %v132_v47 = vld [vmem:[%s1577_s12 + $0x48] sm:$0xff] }
  0x18   : > { %v852_v11 = vadd.f32 %v851_v9, %v208_v8  ;;  %v244_v48 = vld [vmem:[%s1577_s12 + $0x3c8] sm:$0xff]  ;;  %v245_v49 = vld [vmem:[%s1577_s12 + $0x3d0] sm:$0xff]  ;;  %v219_v50 = vld [vmem:[%s1577_s12 + $0x300] sm:$0xff] }
  0x19   : > { %v766_v32 = vadd.f32 %v765_v28, %v127_v26  ;;  %v890_v52 = vadd.f32 %v244_v48, %v243_v45  ;;  %v133_v54 = vld [vmem:[%s1577_s12 + $0x50] sm:$0xff]  ;;  %v246_v55 = vld [vmem:[%s1577_s12 + $0x3d8] sm:$0xff]  ;;  %v220_v56 = vld [vmem:[%s1577_s12 + $0x308] sm:$0xff] }
  0x1a   : > { %v853_v13 = vadd.f32 %v852_v11, %v209_v10  ;;  %v134_v60 = vld [vmem:[%s1577_s12 + $0x58] sm:$0xff]  ;;  %v247_v61 = vld [vmem:[%s1577_s12 + $0x3e0] sm:$0xff]  ;;  %v221_v62 = vld [vmem:[%s1577_s12 + $0x310] sm:$0xff] }
  0x1b   : > { %v767_v36 = vadd.f32 %v766_v32, %v128_v30  ;;  %v891_v58 = vadd.f32 %v890_v52, %v245_v49  ;;  %v135_v2 = vld [vmem:[%s1577_s12 + $0x60] sm:$0xff]  ;;  %v248_v3 = vld [vmem:[%s1577_s12 + $0x3e8] sm:$0xff]  ;;  %v222_v4 = vld [vmem:[%s1577_s12 + $0x318] sm:$0xff] }
  0x1c   : > { %v854_v15 = vadd.f32 %v853_v13, %v210_v12  ;;  %v136_v8 = vld [vmem:[%s1577_s12 + $0x68] sm:$0xff]  ;;  %v249_v9 = vld [vmem:[%s1577_s12 + $0x3f0] sm:$0xff]  ;;  %v223_v10 = vld [vmem:[%s1577_s12 + $0x320] sm:$0xff] }
  0x1d   : > { %v768_v40 = vadd.f32 %v767_v36, %v129_v34  ;;  %v892_v0 = vadd.f32 %v891_v58, %v246_v55  ;;  %v224_v16 = vld [vmem:[%s1577_s12 + $0x328] sm:$0xff]  ;;  %v225_v19 = vld [vmem:[%s1577_s12 + $0x330] sm:$0xff]  ;;  %v251_v22 = vld [vmem:[%s1577_s12 + $0x400] sm:$0xff] }
  0x1e   : > { %v855_v21 = vadd.f32 %v854_v15, %v211_v14  ;;  %v137_v14 = vld [vmem:[%s1577_s12 + $0x70] sm:$0xff]  ;;  %v250_v15 = vld [vmem:[%s1577_s12 + $0x3f8] sm:$0xff]  ;;  %v164_v26 = vld [vmem:[%s1577_s12 + $0x148] sm:$0xff] }
  0x1f   : > { %v769_v44 = vadd.f32 %v768_v40, %v130_v38  ;;  %v893_v6 = vadd.f32 %v892_v0, %v247_v61  ;;  %v252_v30 = vld [vmem:[%s1577_s12 + $0x408] sm:$0xff]  ;;  %v226_v32 = vld [vmem:[%s1577_s12 + $0x338] sm:$0xff]  ;;  %v253_v38 = vld [vmem:[%s1577_s12 + $0x410] sm:$0xff] }
  0x20   : > { %v856_v25 = vadd.f32 %v855_v21, %v212_v18  ;;  %v138_v21 = vld [vmem:[%s1577_s12 + $0x78] sm:$0xff]  ;;  %v227_v40 = vld [vmem:[%s1577_s12 + $0x340] sm:$0xff]  ;;  %v141_v45 = vld [vmem:[%s1577_s12 + $0x90] sm:$0xff] }
  0x21   : > { %v770_v51 = vadd.f32 %v769_v44, %v131_v42  ;;  %v894_v12 = vadd.f32 %v893_v6, %v248_v3  ;;  %v228_v48 = vld [vmem:[%s1577_s12 + $0x348] sm:$0xff]  ;;  %v143_v61 = vld [vmem:[%s1577_s12 + $0xa0] sm:$0xff]  ;;  %v230_v0 = vld [vmem:[%s1577_s12 + $0x358] sm:$0xff] }
  0x22   : > { %v857_v29 = vadd.f32 %v856_v25, %v213_v23  ;;  %v163_v25 = vld [vmem:[%s1577_s12 + $0x140] sm:$0xff]  ;;  %v170_v3 = vld [vmem:[%s1577_s12 + $0x178] sm:$0xff]  ;;  %v257_v6 = vld [vmem:[%s1577_s12 + $0x430] sm:$0xff] }
  0x23   : > { %v771_v57 = vadd.f32 %v770_v51, %v132_v47  ;;  %v895_v18 = vadd.f32 %v894_v12, %v249_v9  ;;  %v168_v51 = vld [vmem:[%s1577_s12 + $0x168] sm:$0xff]  ;;  %v145_v9 = vld [vmem:[%s1577_s12 + $0xb0] sm:$0xff]  ;;  %v171_v12 = vld [vmem:[%s1577_s12 + $0x180] sm:$0xff] }
  0x24   : > { %v858_v33 = vadd.f32 %v857_v29, %v214_v27  ;;  %v165_v27 = vld [vmem:[%s1577_s12 + $0x150] sm:$0xff]  ;;  %v139_v29 = vld [vmem:[%s1577_s12 + $0x80] sm:$0xff] }
  0x25   : > { %v772_v63 = vadd.f32 %v771_v57, %v133_v54  ;;  %v896_v24 = vadd.f32 %v895_v18, %v250_v15  ;;  %v255_v54 = vld [vmem:[%s1577_s12 + $0x420] sm:$0xff]  ;;  %v232_v18 = vld [vmem:[%s1577_s12 + $0x368] sm:$0xff] }
  0x26   : > { %v859_v37 = vadd.f32 %v858_v33, %v215_v31  ;;  %v806_v31 = vadd.f32 %v164_v26, %v163_v25  ;;  %v146_v25 = vld [vmem:[%s1577_s12 + $0xb8] sm:$0xff]  ;;  %v259_v26 = vld [vmem:[%s1577_s12 + $0x440] sm:$0xff] }
  0x27   : > { %v773_v5 = vadd.f32 %v772_v63, %v134_v60  ;;  %v897_v34 = vadd.f32 %v896_v24, %v251_v22  ;;  %v325_v22 = vld [vmem:[%s1577_s12 + $0x650] sm:$0xff] }
  0x28   : > { %v860_v41 = vadd.f32 %v859_v37, %v216_v35  ;;  %v166_v35 = vld [vmem:[%s1577_s12 + $0x158] sm:$0xff]  ;;  %v140_v37 = vld [vmem:[%s1577_s12 + $0x88] sm:$0xff] }
  0x29   : > { %v774_v11 = vadd.f32 %v773_v5, %v135_v2  ;;  %v898_v42 = vadd.f32 %v897_v34, %v252_v30  ;;  %v144_v5 = vld [vmem:[%s1577_s12 + $0xa8] sm:$0xff] }
  0x2a   : > { %v861_v46 = vadd.f32 %v860_v41, %v217_v39  ;;  %v807_v39 = vadd.f32 %v806_v31, %v165_v27 }
  0x2b   : > { %v775_v17 = vadd.f32 %v774_v11, %v136_v8  ;;  %v231_v8 = vld [vmem:[%s1577_s12 + $0x360] sm:$0xff] }
  0x2c   : > { %v862_v53 = vadd.f32 %v861_v46, %v218_v43  ;;  %v167_v43 = vld [vmem:[%s1577_s12 + $0x160] sm:$0xff]  ;;  %v254_v46 = vld [vmem:[%s1577_s12 + $0x418] sm:$0xff]  ;;  %v808_v47 = vadd.f32 %v807_v39, %v166_v35 }
  0x2d   : > { %v776_v23 = vadd.f32 %v775_v17, %v137_v14  ;;  %v258_v14 = vld [vmem:[%s1577_s12 + $0x438] sm:$0xff]  ;;  %v324_v17 = vld [vmem:[%s1577_s12 + $0x648] sm:$0xff]  ;;  %v147_v35 = vld [vmem:[%s1577_s12 + $0xc0] sm:$0xff] }
  0x2e   : > { %v863_v59 = vadd.f32 %v862_v53, %v219_v50  ;;  %v899_v50 = vadd.f32 %v898_v42, %v253_v38  ;;  %v142_v53 = vld [vmem:[%s1577_s12 + $0x98] sm:$0xff]  ;;  %v809_v55 = vadd.f32 %v808_v47, %v167_v43  ;;  %v327_v38 = vld [vmem:[%s1577_s12 + $0x660] sm:$0xff] }
  0x2f   : > { %v777_v33 = vadd.f32 %v776_v23, %v138_v21  ;;  %v172_v21 = vld [vmem:[%s1577_s12 + $0x188] sm:$0xff]  ;;  %v234_v39 = vld [vmem:[%s1577_s12 + $0x378] sm:$0xff] }
  0x30   : > { %v864_v1 = vadd.f32 %v863_v59, %v220_v56  ;;  %v229_v56 = vld [vmem:[%s1577_s12 + $0x350] sm:$0xff]  ;;  %v900_v58 = vadd.f32 %v899_v50, %v254_v46  ;;  %v810_v63 = vadd.f32 %v809_v55, %v168_v51  ;;  %v174_v42 = vld [vmem:[%s1577_s12 + $0x198] sm:$0xff] }
  0x31   : > { %v778_v41 = vadd.f32 %v777_v33, %v139_v29  ;;  %v169_v59 = vld [vmem:[%s1577_s12 + $0x170] sm:$0xff] }
  0x32   : > { %v865_v7 = vadd.f32 %v864_v1, %v221_v62  ;;  %v256_v62 = vld [vmem:[%s1577_s12 + $0x428] sm:$0xff]  ;;  %v901_v2 = vadd.f32 %v900_v58, %v255_v54  ;;  %v233_v29 = vld [vmem:[%s1577_s12 + $0x370] sm:$0xff] }
  0x33   : > { %v779_v49 = vadd.f32 %v778_v41, %v140_v37  ;;  %v261_v46 = vld [vmem:[%s1577_s12 + $0x450] sm:$0xff] }
  0x34   : > { %v866_v13 = vadd.f32 %v865_v7, %v222_v4  ;;  %v811_v7 = vadd.f32 %v810_v63, %v169_v59  ;;  %v902_v11 = vadd.f32 %v901_v2, %v256_v62  ;;  %v149_v55 = vld [vmem:[%s1577_s12 + $0xd0] sm:$0xff]  ;;  %v236_v59 = vld [vmem:[%s1577_s12 + $0x388] sm:$0xff]  ;;  %v150_v2 = vld [vmem:[%s1577_s12 + $0xd8] sm:$0xff] }
  0x35   : > { %v780_v57 = vadd.f32 %v779_v49, %v141_v45  ;;  %v148_v45 = vld [vmem:[%s1577_s12 + $0xc8] sm:$0xff]  ;;  %v235_v49 = vld [vmem:[%s1577_s12 + $0x380] sm:$0xff]  ;;  %v329_v58 = vld [vmem:[%s1577_s12 + $0x670] sm:$0xff] }
  0x36   : > { %v867_v20 = vadd.f32 %v866_v13, %v223_v10  ;;  %v812_v15 = vadd.f32 %v811_v7, %v170_v3  ;;  %v176_v63 = vld [vmem:[%s1577_s12 + $0x1a8] sm:$0xff]  ;;  %v263_v3 = vld [vmem:[%s1577_s12 + $0x460] sm:$0xff] }
  0x37   : > { %v781_v1 = vadd.f32 %v780_v57, %v142_v53  ;;  %v151_v7 = vld [vmem:[%s1577_s12 + $0xe0] sm:$0xff] }
  0x38   : > { %v868_v28 = vadd.f32 %v867_v20, %v224_v16  ;;  %v323_v16 = vld [vmem:[%s1577_s12 + $0x640] sm:$0xff]  ;;  %v903_v20 = vadd.f32 %v902_v11, %v257_v6  ;;  %v813_v27 = vadd.f32 %v812_v15, %v171_v12  ;;  %v238_v6 = vld [vmem:[%s1577_s12 + $0x398] sm:$0xff] }
  0x39   : > { %v782_v10 = vadd.f32 %v781_v1, %v143_v61  ;;  %v974_v23 = vadd.f32 %v324_v17, %v323_v16  ;;  %v331_v16 = vld [vmem:[%s1577_s12 + $0x680] sm:$0xff] }
  0x3a   : > { %v869_v36 = vadd.f32 %v868_v28, %v225_v19  ;;  %v326_v28 = vld [vmem:[%s1577_s12 + $0x658] sm:$0xff]  ;;  %v904_v31 = vadd.f32 %v903_v20, %v258_v14  ;;  %v814_v37 = vadd.f32 %v813_v27, %v172_v21  ;;  %v264_v14 = vld [vmem:[%s1577_s12 + $0x468] sm:$0xff]  ;;  %v239_v17 = vld [vmem:[%s1577_s12 + $0x3a0] sm:$0xff] }
  0x3b   : > { %v783_v19 = vadd.f32 %v782_v10, %v144_v5  ;;  %v975_v33 = vadd.f32 %v974_v23, %v325_v22  ;;  %v330_v5 = vld [vmem:[%s1577_s12 + $0x678] sm:$0xff]  ;;  %v177_v10 = vld [vmem:[%s1577_s12 + $0x1b0] sm:$0xff]  ;;  %v283_v23 = vld [vmem:[%s1577_s12 + $0x500] sm:$0xff] }
  0x3c   : > { %v870_v44 = vadd.f32 %v869_v36, %v226_v32  ;;  %v173_v32 = vld [vmem:[%s1577_s12 + $0x190] sm:$0xff]  ;;  %v260_v36 = vld [vmem:[%s1577_s12 + $0x448] sm:$0xff]  ;;  %v905_v41 = vadd.f32 %v904_v31, %v259_v26  ;;  %v178_v21 = vld [vmem:[%s1577_s12 + $0x1b8] sm:$0xff] }
  0x3d   : > { %v784_v30 = vadd.f32 %v783_v19, %v145_v9  ;;  %v976_v43 = vadd.f32 %v975_v33, %v326_v28  ;;  %v815_v47 = vadd.f32 %v814_v37, %v173_v32  ;;  %v265_v19 = vld [vmem:[%s1577_s12 + $0x470] sm:$0xff]  ;;  %v332_v26 = vld [vmem:[%s1577_s12 + $0x688] sm:$0xff]  ;;  %v179_v33 = vld [vmem:[%s1577_s12 + $0x1c0] sm:$0xff] }
  0x3e   : > { %v871_v52 = vadd.f32 %v870_v44, %v227_v40  ;;  %v906_v51 = vadd.f32 %v905_v41, %v260_v36  ;;  %v284_v27 = vld [vmem:[%s1577_s12 + $0x508] sm:$0xff]  ;;  %v285_v28 = vld [vmem:[%s1577_s12 + $0x510] sm:$0xff]  ;;  %v266_v37 = vld [vmem:[%s1577_s12 + $0x478] sm:$0xff] }
  0x3f   : > { %v785_v40 = vadd.f32 %v784_v30, %v146_v25  ;;  %v977_v53 = vadd.f32 %v976_v43, %v327_v38  ;;  %v816_v57 = vadd.f32 %v815_v47, %v174_v42  ;;  %v153_v30 = vld [vmem:[%s1577_s12 + $0xf0] sm:$0xff]  ;;  %v242_v41 = vld [vmem:[%s1577_s12 + $0x3b8] sm:$0xff] }
  0x40   : > { %v872_v60 = vadd.f32 %v871_v52, %v228_v48  ;;  %v328_v48 = vld [vmem:[%s1577_s12 + $0x668] sm:$0xff]  ;;  %v175_v52 = vld [vmem:[%s1577_s12 + $0x1a0] sm:$0xff]  ;;  %v907_v62 = vadd.f32 %v906_v51, %v261_v46  ;;  %v154_v42 = vld [vmem:[%s1577_s12 + $0xf8] sm:$0xff] }
  0x41   : > { %v786_v50 = vadd.f32 %v785_v40, %v147_v35  ;;  %v932_v35 = vadd.f32 %v284_v27, %v283_v23  ;;  %v286_v40 = vld [vmem:[%s1577_s12 + $0x518] sm:$0xff] }
  0x42   : > { %v873_v4 = vadd.f32 %v872_v60, %v229_v56  ;;  %v262_v56 = vld [vmem:[%s1577_s12 + $0x458] sm:$0xff]  ;;  %v237_v60 = vld [vmem:[%s1577_s12 + $0x390] sm:$0xff] }
  0x43   : > { %v787_v61 = vadd.f32 %v786_v50, %v148_v45  ;;  %v908_v9 = vadd.f32 %v907_v62, %v262_v56  ;;  %v180_v45 = vld [vmem:[%s1577_s12 + $0x1c8] sm:$0xff]  ;;  %v933_v47 = vadd.f32 %v932_v35, %v285_v28  ;;  %v334_v51 = vld [vmem:[%s1577_s12 + $0x698] sm:$0xff]  ;;  %v291_v35 = vld [vmem:[%s1577_s12 + $0x540] sm:$0xff] }
  0x44   : > { %v874_v13 = vadd.f32 %v873_v4, %v230_v0  ;;  %v978_v0 = vadd.f32 %v977_v53, %v328_v48  ;;  %v817_v4 = vadd.f32 %v816_v57, %v175_v52  ;;  %v287_v52 = vld [vmem:[%s1577_s12 + $0x520] sm:$0xff]  ;;  %v241_v53 = vld [vmem:[%s1577_s12 + $0x3b0] sm:$0xff]  ;;  %v268_v62 = vld [vmem:[%s1577_s12 + $0x488] sm:$0xff] }
  0x45   : > { %v909_v20 = vadd.f32 %v908_v9, %v263_v3  ;;  %v181_v57 = vld [vmem:[%s1577_s12 + $0x1d0] sm:$0xff]  ;;  %v290_v23 = vld [vmem:[%s1577_s12 + $0x538] sm:$0xff]  ;;  %v184_v28 = vld [vmem:[%s1577_s12 + $0x1e8] sm:$0xff] }
  0x46   : > { %v875_v24 = vadd.f32 %v874_v13, %v231_v8  ;;  %v788_v8 = vadd.f32 %v787_v61, %v149_v55  ;;  %v979_v11 = vadd.f32 %v978_v0, %v329_v58  ;;  %v152_v13 = vld [vmem:[%s1577_s12 + $0xe8] sm:$0xff]  ;;  %v818_v15 = vadd.f32 %v817_v4, %v176_v63  ;;  %v335_v0 = vld [vmem:[%s1577_s12 + $0x6a0] sm:$0xff]  ;;  %v269_v9 = vld [vmem:[%s1577_s12 + $0x490] sm:$0xff] }
  0x47   : > { %v910_v32 = vadd.f32 %v909_v20, %v264_v14  ;;  %v886_v61 = vsel %vm801_vm0, %v242_v41, 0.0  ;;  %v270_v20 = vld [vmem:[%s1577_s12 + $0x498] sm:$0xff]  ;;  %v404_v41 = vld [vmem:[%s1577_s12 + $0x8c8] sm:$0xff] }
  0x48   : > { %v876_v34 = vadd.f32 %v875_v24, %v232_v18  ;;  %v789_v18 = vadd.f32 %v788_v8, %v150_v2  ;;  %v980_v22 = vadd.f32 %v979_v11, %v330_v5  ;;  %v819_v25 = vadd.f32 %v818_v15, %v177_v10  ;;  %v156_v2 = vld [vmem:[%s1577_s12 + $0x108] sm:$0xff]  ;;  %v182_v5 = vld [vmem:[%s1577_s12 + $0x1d8] sm:$0xff] }
  0x49   : > { %v336_v11 = vld [vmem:[%s1577_s12 + $0x6a8] sm:$0xff] }
  0x4a   : > { %v877_v44 = vadd.f32 %v876_v34, %v233_v29  ;;  %v240_v29 = vld [vmem:[%s1577_s12 + $0x3a8] sm:$0xff]  ;;  %v790_v31 = vadd.f32 %v789_v18, %v151_v7  ;;  %v981_v34 = vadd.f32 %v980_v22, %v331_v16  ;;  %v820_v38 = vadd.f32 %v819_v25, %v178_v21  ;;  %v183_v16 = vld [vmem:[%s1577_s12 + $0x1e0] sm:$0xff]  ;;  %v337_v22 = vld [vmem:[%s1577_s12 + $0x6b0] sm:$0xff] }
  0x4c   : > { %v878_v54 = vadd.f32 %v877_v44, %v234_v39  ;;  %v333_v39 = vld [vmem:[%s1577_s12 + $0x690] sm:$0xff]  ;;  %v791_v43 = vadd.f32 %v790_v31, %v152_v13  ;;  %v911_v44 = vadd.f32 %v910_v32, %v265_v19  ;;  %v982_v46 = vadd.f32 %v981_v34, %v332_v26  ;;  %v271_v26 = vld [vmem:[%s1577_s12 + $0x4a0] sm:$0xff]  ;;  %v338_v34 = vld [vmem:[%s1577_s12 + $0x6b8] sm:$0xff] }
  0x4d   : > { %v821_v50 = vadd.f32 %v820_v38, %v179_v33  ;;  %v157_v13 = vld [vmem:[%s1577_s12 + $0x110] sm:$0xff]  ;;  %v159_v31 = vld [vmem:[%s1577_s12 + $0x120] sm:$0xff] }
  0x4e   : > { %v879_v1 = vadd.f32 %v878_v54, %v235_v49  ;;  %v267_v49 = vld [vmem:[%s1577_s12 + $0x480] sm:$0xff]  ;;  %v792_v55 = vadd.f32 %v791_v43, %v153_v30  ;;  %v912_v56 = vadd.f32 %v911_v44, %v266_v37  ;;  %v983_v58 = vadd.f32 %v982_v46, %v333_v39  ;;  %v185_v32 = vld [vmem:[%s1577_s12 + $0x1f0] sm:$0xff]  ;;  %v272_v43 = vld [vmem:[%s1577_s12 + $0x4a8] sm:$0xff] }
  0x4f   : > { %v155_v54 = vld [vmem:[%s1577_s12 + $0x100] sm:$0xff]  ;;  %v822_v63 = vadd.f32 %v821_v50, %v180_v45  ;;  %v292_v46 = vld [vmem:[%s1577_s12 + $0x548] sm:$0xff] }
  0x50   : > { %v880_v12 = vadd.f32 %v879_v1, %v236_v59  ;;  %v934_v59 = vadd.f32 %v933_v47, %v286_v40  ;;  %v288_v1 = vld [vmem:[%s1577_s12 + $0x528] sm:$0xff]  ;;  %v793_v3 = vadd.f32 %v792_v55, %v154_v42  ;;  %v913_v4 = vadd.f32 %v912_v56, %v267_v49  ;;  %v403_v40 = vld [vmem:[%s1577_s12 + $0x8c0] sm:$0xff]  ;;  %v405_v42 = vld [vmem:[%s1577_s12 + $0x8d0] sm:$0xff] }
  0x51   : > { %v823_v10 = vadd.f32 %v822_v63, %v181_v57  ;;  %v339_v45 = vld [vmem:[%s1577_s12 + $0x6c0] sm:$0xff]  ;;  %v1058_v47 = vadd.f32 %v404_v41, %v403_v40  ;;  %v161_v55 = vld [vmem:[%s1577_s12 + $0x130] sm:$0xff]  ;;  %v344_v41 = vld [vmem:[%s1577_s12 + $0x6e8] sm:$0xff] }
  0x52   : > { %v881_v24 = vadd.f32 %v880_v12, %v237_v60  ;;  %v935_v7 = vadd.f32 %v934_v59, %v287_v52  ;;  %v289_v12 = vld [vmem:[%s1577_s12 + $0x530] sm:$0xff]  ;;  %v794_v14 = vadd.f32 %v793_v3, %v155_v54  ;;  %v914_v15 = vadd.f32 %v913_v4, %v268_v62  ;;  %v406_v54 = vld [vmem:[%s1577_s12 + $0x8d8] sm:$0xff]  ;;  %v407_v3 = vld [vmem:[%s1577_s12 + $0x8e0] sm:$0xff] }
  0x53   : > { %v824_v21 = vadd.f32 %v823_v10, %v182_v5  ;;  %v273_v56 = vld [vmem:[%s1577_s12 + $0x4b0] sm:$0xff]  ;;  %v274_v4 = vld [vmem:[%s1577_s12 + $0x4b8] sm:$0xff] }
  0x54   : > { %v882_v36 = vadd.f32 %v881_v24, %v238_v6  ;;  %v984_v6 = vadd.f32 %v983_v58, %v334_v51  ;;  %v936_v18 = vadd.f32 %v935_v7, %v288_v1  ;;  %v158_v24 = vld [vmem:[%s1577_s12 + $0x118] sm:$0xff]  ;;  %v795_v25 = vadd.f32 %v794_v14, %v156_v2  ;;  %v340_v58 = vld [vmem:[%s1577_s12 + $0x6c8] sm:$0xff]  ;;  %v293_v59 = vld [vmem:[%s1577_s12 + $0x550] sm:$0xff] }
  0x55   : > { %v915_v27 = vadd.f32 %v914_v15, %v269_v9  ;;  %v825_v33 = vadd.f32 %v824_v21, %v183_v16  ;;  %v186_v51 = vld [vmem:[%s1577_s12 + $0x1f8] sm:$0xff]  ;;  %v408_v14 = vld [vmem:[%s1577_s12 + $0x8e8] sm:$0xff]  ;;  %v275_v16 = vld [vmem:[%s1577_s12 + $0x4c0] sm:$0xff] }
  0x56   : > { %v883_v48 = vadd.f32 %v882_v36, %v239_v17  ;;  %v985_v17 = vadd.f32 %v984_v6, %v335_v0  ;;  %v937_v30 = vadd.f32 %v936_v18, %v289_v12  ;;  %v796_v36 = vadd.f32 %v795_v25, %v157_v13  ;;  %v187_v0 = vld [vmem:[%s1577_s12 + $0x200] sm:$0xff]  ;;  %v341_v6 = vld [vmem:[%s1577_s12 + $0x6d0] sm:$0xff]  ;;  %v294_v7 = vld [vmem:[%s1577_s12 + $0x558] sm:$0xff] }
  0x57   : > { %v916_v37 = vadd.f32 %v915_v27, %v270_v20  ;;  %v826_v44 = vadd.f32 %v825_v33, %v184_v28  ;;  %v342_v18 = vld [vmem:[%s1577_s12 + $0x6d8] sm:$0xff]  ;;  %v276_v27 = vld [vmem:[%s1577_s12 + $0x4c8] sm:$0xff]  ;;  %v277_v33 = vld [vmem:[%s1577_s12 + $0x4d0] sm:$0xff] }
  0x58   : > { %v884_v60 = vadd.f32 %v883_v48, %v240_v29  ;;  %v986_v29 = vadd.f32 %v985_v17, %v336_v11  ;;  %v938_v39 = vadd.f32 %v937_v30, %v290_v23  ;;  %v160_v48 = vld [vmem:[%s1577_s12 + $0x128] sm:$0xff]  ;;  %v797_v49 = vadd.f32 %v796_v36, %v158_v24  ;;  %v189_v23 = vld [vmem:[%s1577_s12 + $0x210] sm:$0xff] }
  0x59   : > { %v917_v50 = vadd.f32 %v916_v37, %v271_v26  ;;  %v827_v57 = vadd.f32 %v826_v44, %v185_v32  ;;  %v188_v11 = vld [vmem:[%s1577_s12 + $0x208] sm:$0xff]  ;;  %v409_v26 = vld [vmem:[%s1577_s12 + $0x8f0] sm:$0xff] }
  0x5a   : > { %v885_v8 = vadd.f32 %v884_v60, %v241_v53  ;;  %v987_v38 = vadd.f32 %v986_v29, %v337_v22  ;;  %v939_v53 = vadd.f32 %v938_v39, %v291_v35  ;;  %v1059_v60 = vadd.f32 %v1058_v47, %v405_v42  ;;  %v343_v29 = vld [vmem:[%s1577_s12 + $0x6e0] sm:$0xff]  ;;  %v296_v30 = vld [vmem:[%s1577_s12 + $0x568] sm:$0xff]  ;;  %v190_v35 = vld [vmem:[%s1577_s12 + $0x218] sm:$0xff] }
  0x5b   : > { %v798_v62 = vadd.f32 %v797_v49, %v159_v31  ;;  %v918_v63 = vadd.f32 %v917_v50, %v272_v43  ;;  %v828_v5 = vadd.f32 %v827_v57, %v186_v51  ;;  %v278_v39 = vld [vmem:[%s1577_s12 + $0x4d8] sm:$0xff]  ;;  %v297_v42 = vld [vmem:[%s1577_s12 + $0x570] sm:$0xff]  ;;  %v411_v49 = vld [vmem:[%s1577_s12 + $0x900] sm:$0xff] }
  0x5c   : > { %v887_v19 = vadd.f32 %v886_v61, %v885_v8  ;;  %v988_v52 = vadd.f32 %v987_v38, %v338_v34  ;;  %v162_v61 = vld [vmem:[%s1577_s12 + $0x138] sm:$0xff]  ;;  %v940_v2 = vadd.f32 %v939_v53, %v292_v46  ;;  %v1060_v8 = vadd.f32 %v1059_v60, %v406_v54  ;;  %v345_v46 = vld [vmem:[%s1577_s12 + $0x6f0] sm:$0xff]  ;;  %v279_v50 = vld [vmem:[%s1577_s12 + $0x4e0] sm:$0xff] }
  0x5d   : > { %v799_v9 = vadd.f32 %v798_v62, %v160_v48  ;;  %v919_v10 = vadd.f32 %v918_v63, %v273_v56  ;;  %v802_v15 = vsel %vm801_vm0, %v162_v61, 0.0  ;;  %v829_v17 = vadd.f32 %v828_v5, %v187_v0  ;;  %v410_v38 = vld [vmem:[%s1577_s12 + $0x8f8] sm:$0xff]  ;;  %v363_v54 = vld [vmem:[%s1577_s12 + $0x780] sm:$0xff]  ;;  %v192_v57 = vld [vmem:[%s1577_s12 + $0x228] sm:$0xff] }
  0x5e   : > { %888 = vadd.xlane.f32.xlu1 %v887_v19  ;;  %v989_v1 = vadd.f32 %v988_v52, %v339_v45  ;;  %v941_v13 = vadd.f32 %v940_v2, %v293_v59  ;;  %v295_v19 = vld [vmem:[%s1577_s12 + $0x560] sm:$0xff]  ;;  %v1061_v20 = vadd.f32 %v1060_v8, %v407_v3  ;;  %v298_v52 = vld [vmem:[%s1577_s12 + $0x578] sm:$0xff]  ;;  %v412_v60 = vld [vmem:[%s1577_s12 + $0x908] sm:$0xff] }
  0x5f   : > { %v800_v21 = vadd.f32 %v799_v9, %v161_v55  ;;  %v920_v22 = vadd.f32 %v919_v10, %v274_v4  ;;  %v830_v28 = vadd.f32 %v829_v17, %v188_v11  ;;  %v191_v45 = vld [vmem:[%s1577_s12 + $0x220] sm:$0xff]  ;;  %v364_v55 = vld [vmem:[%s1577_s12 + $0x788] sm:$0xff]  ;;  %v365_v61 = vld [vmem:[%s1577_s12 + $0x790] sm:$0xff] }
  0x60   : > { %v990_v12 = vadd.f32 %v989_v1, %v340_v58  ;;  %v942_v25 = vadd.f32 %v941_v13, %v294_v7  ;;  %v1062_v31 = vadd.f32 %v1061_v20, %v408_v14  ;;  %v280_v62 = vld [vmem:[%s1577_s12 + $0x4e8] sm:$0xff]  ;;  %v346_v0 = vld [vmem:[%s1577_s12 + $0x6f8] sm:$0xff]  ;;  %v299_v1 = vld [vmem:[%s1577_s12 + $0x580] sm:$0xff]  ;;  %v1016_v3 = vadd.f32 %v364_v55, %v363_v54 }
  0x61   : > { %v803_v32 = vadd.f32 %v802_v15, %v800_v21  ;;  %v921_v34 = vadd.f32 %v920_v22, %v275_v16  ;;  %v831_v40 = vadd.f32 %v830_v28, %v189_v23  ;;  %v193_v5 = vld [vmem:[%s1577_s12 + $0x230] sm:$0xff]  ;;  %v366_v9 = vld [vmem:[%s1577_s12 + $0x798] sm:$0xff]  ;;  %v300_v13 = vld [vmem:[%s1577_s12 + $0x588] sm:$0xff] }
  0x62   : > { %v991_v24 = vadd.f32 %v990_v12, %v341_v6  ;;  %v943_v37 = vadd.f32 %v942_v25, %v295_v19  ;;  %v1063_v43 = vadd.f32 %v1062_v31, %v409_v26  ;;  %v413_v8 = vld [vmem:[%s1577_s12 + $0x910] sm:$0xff]  ;;  %v282_v10 = vld [vmem:[%s1577_s12 + $0x4f8] sm:$0xff]  ;;  %v347_v12 = vld [vmem:[%s1577_s12 + $0x700] sm:$0xff]  ;;  %v1017_v15 = vadd.f32 %v1016_v3, %v365_v61 }
  0x63   : > { %804 = vadd.xlane.f32.xlu0 %v803_v32  ;;  %v922_v44 = vadd.f32 %v921_v34, %v276_v27  ;;  %v832_v51 = vadd.f32 %v831_v40, %v190_v35  ;;  %v194_v17 = vld [vmem:[%s1577_s12 + $0x238] sm:$0xff]  ;;  %v367_v21 = vld [vmem:[%s1577_s12 + $0x7a0] sm:$0xff]  ;;  %v281_v22 = vld [vmem:[%s1577_s12 + $0x4f0] sm:$0xff]  ;;  %v928_v34 = vsel %vm801_vm0, %v282_v10, 0.0 }
  0x64   : > { %v992_v36 = vadd.f32 %v991_v24, %v342_v18  ;;  %v944_v48 = vadd.f32 %v943_v37, %v296_v30  ;;  %v1064_v53 = vadd.f32 %v1063_v43, %v410_v38  ;;  %v414_v20 = vld [vmem:[%s1577_s12 + $0x918] sm:$0xff]  ;;  %v348_v24 = vld [vmem:[%s1577_s12 + $0x708] sm:$0xff]  ;;  %v301_v25 = vld [vmem:[%s1577_s12 + $0x590] sm:$0xff]  ;;  %v1018_v27 = vadd.f32 %v1017_v15, %v366_v9 }
  0x65   : > { %v923_v56 = vadd.f32 %v922_v44, %v277_v33  ;;  %v833_v63 = vadd.f32 %v832_v51, %v191_v45  ;;  %v415_v32 = vld [vmem:[%s1577_s12 + $0x920] sm:$0xff]  ;;  %v368_v33 = vld [vmem:[%s1577_s12 + $0x7a8] sm:$0xff]  ;;  %v302_v37 = vld [vmem:[%s1577_s12 + $0x598] sm:$0xff] }
  0x66   : > { %v993_v47 = vadd.f32 %v992_v36, %v343_v29  ;;  %v945_v59 = vadd.f32 %v944_v48, %v297_v42  ;;  %v1065_v2 = vadd.f32 %v1064_v53, %v411_v49  ;;  %v195_v29 = vld [vmem:[%s1577_s12 + $0x240] sm:$0xff]  ;;  %v349_v36 = vld [vmem:[%s1577_s12 + $0x710] sm:$0xff]  ;;  %v416_v44 = vld [vmem:[%s1577_s12 + $0x928] sm:$0xff] }
  0x67   : > { %v924_v4 = vadd.f32 %v923_v56, %v278_v39  ;;  %v834_v11 = vadd.f32 %v833_v63, %v192_v57  ;;  %v1019_v39 = vadd.f32 %v1018_v27, %v367_v21  ;;  %v369_v45 = vld [vmem:[%s1577_s12 + $0x7b0] sm:$0xff]  ;;  %v350_v48 = vld [vmem:[%s1577_s12 + $0x718] sm:$0xff]  ;;  %v303_v49 = vld [vmem:[%s1577_s12 + $0x5a0] sm:$0xff] }
  0x68   : > { %v994_v58 = vadd.f32 %v993_v47, %v344_v41  ;;  %v946_v7 = vadd.f32 %v945_v59, %v298_v52  ;;  %v1066_v14 = vadd.f32 %v1065_v2, %v412_v60  ;;  %v196_v41 = vld [vmem:[%s1577_s12 + $0x248] sm:$0xff]  ;;  %v198_v53 = vld [vmem:[%s1577_s12 + $0x258] sm:$0xff]  ;;  %v417_v56 = vld [vmem:[%s1577_s12 + $0x930] sm:$0xff] }
  0x69   : > { %v925_v16 = vadd.f32 %v924_v4, %v279_v50  ;;  %v835_v23 = vadd.f32 %v834_v11, %v193_v5  ;;  %v1020_v51 = vadd.f32 %v1019_v39, %v368_v33  ;;  %v370_v57 = vld [vmem:[%s1577_s12 + $0x7b8] sm:$0xff]  ;;  %v351_v59 = vld [vmem:[%s1577_s12 + $0x720] sm:$0xff]  ;;  %v352_v60 = vld [vmem:[%s1577_s12 + $0x728] sm:$0xff] }
  0x6a   : > { %v995_v6 = vadd.f32 %v994_v58, %v345_v46  ;;  %v947_v19 = vadd.f32 %v946_v7, %v299_v1  ;;  %v1067_v26 = vadd.f32 %v1066_v14, %v413_v8  ;;  %v197_v46 = vld [vmem:[%s1577_s12 + $0x250] sm:$0xff]  ;;  %v304_v61 = vld [vmem:[%s1577_s12 + $0x5a8] sm:$0xff]  ;;  %v418_v3 = vld [vmem:[%s1577_s12 + $0x938] sm:$0xff] }
  0x6b   : > { %v926_v28 = vadd.f32 %v925_v16, %v280_v62  ;;  %v836_v35 = vadd.f32 %v835_v23, %v194_v17  ;;  %v1021_v63 = vadd.f32 %v1020_v51, %v369_v45  ;;  %v371_v4 = vld [vmem:[%s1577_s12 + $0x7c0] sm:$0xff]  ;;  %v305_v7 = vld [vmem:[%s1577_s12 + $0x5b0] sm:$0xff]  ;;  %v484_v10 = vld [vmem:[%s1577_s12 + $0xb48] sm:$0xff] }
  0x6c   : > { %v996_v18 = vadd.f32 %v995_v6, %v346_v0  ;;  %v948_v31 = vadd.f32 %v947_v19, %v300_v13  ;;  %v1068_v38 = vadd.f32 %v1067_v26, %v414_v20  ;;  %v199_v0 = vld [vmem:[%s1577_s12 + $0x260] sm:$0xff]  ;;  %v485_v11 = vld [vmem:[%s1577_s12 + $0xb50] sm:$0xff]  ;;  %v372_v16 = vld [vmem:[%s1577_s12 + $0x7c8] sm:$0xff] }
  0x6d   : > { %v927_v40 = vadd.f32 %v926_v28, %v281_v22  ;;  %v837_v47 = vadd.f32 %v836_v35, %v195_v29  ;;  %v483_v5 = vld [vmem:[%s1577_s12 + $0xb40] sm:$0xff]  ;;  %v1022_v9 = vadd.f32 %v1021_v63, %v370_v57  ;;  %v353_v19 = vld [vmem:[%s1577_s12 + $0x730] sm:$0xff]  ;;  %v306_v20 = vld [vmem:[%s1577_s12 + $0x5b8] sm:$0xff] }
  0x6e   : > { %v997_v30 = vadd.f32 %v996_v18, %v347_v12  ;;  %v949_v43 = vadd.f32 %v948_v31, %v301_v25  ;;  %v1069_v50 = vadd.f32 %v1068_v38, %v415_v32  ;;  %v200_v12 = vld [vmem:[%s1577_s12 + $0x268] sm:$0xff]  ;;  %v419_v15 = vld [vmem:[%s1577_s12 + $0x940] sm:$0xff]  ;;  %v1142_v17 = vadd.f32 %v484_v10, %v483_v5  ;;  %v486_v23 = vld [vmem:[%s1577_s12 + $0xb58] sm:$0xff] }
  0x6f   : > { %v929_v52 = vadd.f32 %v928_v34, %v927_v40  ;;  %v838_v58 = vadd.f32 %v837_v47, %v196_v41  ;;  %v1023_v22 = vadd.f32 %v1022_v9, %v371_v4  ;;  %v420_v27 = vld [vmem:[%s1577_s12 + $0x948] sm:$0xff]  ;;  %v373_v28 = vld [vmem:[%s1577_s12 + $0x7d0] sm:$0xff]  ;;  %v354_v31 = vld [vmem:[%s1577_s12 + $0x738] sm:$0xff] }
  0x70   : > { %v998_v42 = vadd.f32 %v997_v30, %v348_v24  ;;  %v950_v55 = vadd.f32 %v949_v43, %v302_v37  ;;  %v1070_v62 = vadd.f32 %v1069_v50, %v416_v44  ;;  %v202_v24 = vld [vmem:[%s1577_s12 + $0x278] sm:$0xff]  ;;  %v1143_v29 = vadd.f32 %v1142_v17, %v485_v11  ;;  %v307_v32 = vld [vmem:[%s1577_s12 + $0x5c0] sm:$0xff]  ;;  %v421_v39 = vld [vmem:[%s1577_s12 + $0x950] sm:$0xff] }
  0x71   : > { %930 = vadd.xlane.f32.xlu1 %v929_v52  ;;  %v839_v6 = vadd.f32 %v838_v58, %v197_v46  ;;  %v1024_v34 = vadd.f32 %v1023_v22, %v372_v16  ;;  %v487_v35 = vld [vmem:[%s1577_s12 + $0xb60] sm:$0xff]  ;;  %v374_v40 = vld [vmem:[%s1577_s12 + $0x7d8] sm:$0xff]  ;;  %v308_v44 = vld [vmem:[%s1577_s12 + $0x5c8] sm:$0xff] }
  0x72   : > { %v999_v54 = vadd.f32 %v998_v42, %v349_v36  ;;  %v951_v2 = vadd.f32 %v950_v55, %v303_v49  ;;  %v1071_v8 = vadd.f32 %v1070_v62, %v417_v56  ;;  %v201_v36 = vld [vmem:[%s1577_s12 + $0x270] sm:$0xff]  ;;  %v1144_v41 = vadd.f32 %v1143_v29, %v486_v23  ;;  %v355_v43 = vld [vmem:[%s1577_s12 + $0x740] sm:$0xff]  ;;  %v488_v47 = vld [vmem:[%s1577_s12 + $0xb68] sm:$0xff] }
  0x73   : > { %v840_v18 = vadd.f32 %v839_v6, %v198_v53  ;;  %v1025_v46 = vadd.f32 %v1024_v34, %v373_v28  ;;  %v422_v51 = vld [vmem:[%s1577_s12 + $0x958] sm:$0xff]  ;;  %v375_v52 = vld [vmem:[%s1577_s12 + $0x7e0] sm:$0xff]  ;;  %v356_v55 = vld [vmem:[%s1577_s12 + $0x748] sm:$0xff] }
  0x74   : > { %v1000_v1 = vadd.f32 %v999_v54, %v350_v48  ;;  %v952_v14 = vadd.f32 %v951_v2, %v304_v61  ;;  %v1072_v21 = vadd.f32 %v1071_v8, %v418_v3  ;;  %v844_v48 = vsel %vm801_vm0, %v202_v24, 0.0  ;;  %v309_v56 = vld [vmem:[%s1577_s12 + $0x5d0] sm:$0xff]  ;;  %v423_v63 = vld [vmem:[%s1577_s12 + $0x960] sm:$0xff]  ;;  %v358_v3 = vld [vmem:[%s1577_s12 + $0x758] sm:$0xff] }
  0x75   : > { %v841_v30 = vadd.f32 %v840_v18, %v199_v0  ;;  %v1145_v53 = vadd.f32 %v1144_v41, %v487_v35  ;;  %v1026_v58 = vadd.f32 %v1025_v46, %v374_v40  ;;  %v376_v0 = vld [vmem:[%s1577_s12 + $0x7e8] sm:$0xff]  ;;  %v310_v4 = vld [vmem:[%s1577_s12 + $0x5d8] sm:$0xff]  ;;  %v311_v9 = vld [vmem:[%s1577_s12 + $0x5e0] sm:$0xff] }
  0x76   : > { %v1001_v13 = vadd.f32 %v1000_v1, %v351_v59  ;;  %v953_v26 = vadd.f32 %v952_v14, %v305_v7  ;;  %v1073_v33 = vadd.f32 %v1072_v21, %v419_v15  ;;  %v489_v59 = vld [vmem:[%s1577_s12 + $0xb70] sm:$0xff]  ;;  %v490_v7 = vld [vmem:[%s1577_s12 + $0xb78] sm:$0xff]  ;;  %v424_v11 = vld [vmem:[%s1577_s12 + $0x968] sm:$0xff] }
  0x77   : > { %v842_v42 = vadd.f32 %v841_v30, %v200_v12  ;;  %v1146_v1 = vadd.f32 %v1145_v53, %v488_v47  ;;  %v1027_v6 = vadd.f32 %v1026_v58, %v375_v52  ;;  %v377_v12 = vld [vmem:[%s1577_s12 + $0x7f0] sm:$0xff]  ;;  %v359_v14 = vld [vmem:[%s1577_s12 + $0x760] sm:$0xff]  ;;  %v378_v17 = vld [vmem:[%s1577_s12 + $0x7f8] sm:$0xff] }
  0x78   : > { %v1002_v25 = vadd.f32 %v1001_v13, %v352_v60  ;;  %v954_v38 = vadd.f32 %v953_v26, %v306_v20  ;;  %v1074_v45 = vadd.f32 %v1073_v33, %v420_v27  ;;  %v357_v60 = vld [vmem:[%s1577_s12 + $0x750] sm:$0xff]  ;;  %v443_v23 = vld [vmem:[%s1577_s12 + $0xa00] sm:$0xff]  ;;  %v444_v24 = vld [vmem:[%s1577_s12 + $0xa08] sm:$0xff] }
  0x79   : > { %v843_v54 = vadd.f32 %v842_v42, %v201_v36  ;;  %v1147_v13 = vadd.f32 %v1146_v1, %v489_v59  ;;  %v425_v15 = vld [vmem:[%s1577_s12 + $0x970] sm:$0xff]  ;;  %v1028_v18 = vadd.f32 %v1027_v6, %v376_v0  ;;  %v360_v26 = vld [vmem:[%s1577_s12 + $0x768] sm:$0xff]  ;;  %v426_v34 = vld [vmem:[%s1577_s12 + $0x978] sm:$0xff] }
  0x7a   : > { %v1003_v37 = vadd.f32 %v1002_v25, %v353_v19  ;;  %v955_v50 = vadd.f32 %v954_v38, %v307_v32  ;;  %v1075_v57 = vadd.f32 %v1074_v45, %v421_v39  ;;  %v491_v19 = vld [vmem:[%s1577_s12 + $0xb80] sm:$0xff]  ;;  %v445_v25 = vld [vmem:[%s1577_s12 + $0xa10] sm:$0xff]  ;;  %v312_v27 = vld [vmem:[%s1577_s12 + $0x5e8] sm:$0xff] }
  0x7b   : > { %v845_v2 = vadd.f32 %v844_v48, %v843_v54  ;;  %v1148_v22 = vadd.f32 %v1147_v13, %v490_v7  ;;  %v1029_v29 = vadd.f32 %v1028_v18, %v377_v12  ;;  %v492_v30 = vld [vmem:[%s1577_s12 + $0xb88] sm:$0xff]  ;;  %v379_v35 = vld [vmem:[%s1577_s12 + $0x800] sm:$0xff]  ;;  %v362_v38 = vld [vmem:[%s1577_s12 + $0x778] sm:$0xff] }
  0x7c   : > { %v1004_v49 = vadd.f32 %v1003_v37, %v354_v31  ;;  %v956_v62 = vadd.f32 %v955_v50, %v308_v44  ;;  %v1076_v5 = vadd.f32 %v1075_v57, %v422_v51  ;;  %v1100_v31 = vadd.f32 %v444_v24, %v443_v23  ;;  %v446_v37 = vld [vmem:[%s1577_s12 + $0xa18] sm:$0xff]  ;;  %v313_v39 = vld [vmem:[%s1577_s12 + $0x5f0] sm:$0xff]  ;;  %v427_v46 = vld [vmem:[%s1577_s12 + $0x980] sm:$0xff] }
  0x7d   : > { %846 = vadd.xlane.f32.xlu0 %v845_v2  ;;  %v1149_v36 = vadd.f32 %v1148_v22, %v491_v19  ;;  %v1030_v41 = vadd.f32 %v1029_v29, %v378_v17  ;;  %v493_v42 = vld [vmem:[%s1577_s12 + $0xb90] sm:$0xff]  ;;  %v380_v47 = vld [vmem:[%s1577_s12 + $0x808] sm:$0xff]  ;;  %v314_v51 = vld [vmem:[%s1577_s12 + $0x5f8] sm:$0xff] }
  0x7e   : > { %v1005_v61 = vadd.f32 %v1004_v49, %v355_v43  ;;  %v957_v10 = vadd.f32 %v956_v62, %v309_v56  ;;  %v1077_v16 = vadd.f32 %v1076_v5, %v423_v63  ;;  %v1101_v43 = vadd.f32 %v1100_v31, %v445_v25  ;;  %v447_v49 = vld [vmem:[%s1577_s12 + $0xa20] sm:$0xff]  ;;  %v361_v50 = vld [vmem:[%s1577_s12 + $0x770] sm:$0xff]  ;;  %v494_v54 = vld [vmem:[%s1577_s12 + $0xb98] sm:$0xff] }
  0x7f   : > { %v1150_v48 = vadd.f32 %v1149_v36, %v492_v30  ;;  %v1031_v53 = vadd.f32 %v1030_v41, %v379_v35  ;;  %v428_v58 = vld [vmem:[%s1577_s12 + $0x988] sm:$0xff]  ;;  %v381_v59 = vld [vmem:[%s1577_s12 + $0x810] sm:$0xff]  ;;  %v1012_v62 = vsel %vm801_vm0, %v362_v38, 0.0  ;;  %v315_v63 = vld [vmem:[%s1577_s12 + $0x600] sm:$0xff] }
  0x80   : > { %v1006_v8 = vadd.f32 %v1005_v61, %v356_v55  ;;  %v958_v21 = vadd.f32 %v957_v10, %v310_v4  ;;  %v1078_v28 = vadd.f32 %v1077_v16, %v424_v11  ;;  %v1102_v55 = vadd.f32 %v1101_v43, %v446_v37  ;;  %v448_v61 = vld [vmem:[%s1577_s12 + $0xa28] sm:$0xff]  ;;  %v495_v2 = vld [vmem:[%s1577_s12 + $0xba0] sm:$0xff]  ;;  %v429_v6 = vld [vmem:[%s1577_s12 + $0x990] sm:$0xff] }
  0x81   : > { %v1032_v1 = vadd.f32 %v1031_v53, %v380_v47  ;;  %v382_v7 = vld [vmem:[%s1577_s12 + $0x818] sm:$0xff]  ;;  %v316_v10 = vld [vmem:[%s1577_s12 + $0x608] sm:$0xff]  ;;  %v317_v11 = vld [vmem:[%s1577_s12 + $0x610] sm:$0xff] }
  0x82   : > { %v1007_v20 = vadd.f32 %v1006_v8, %v357_v60  ;;  %v959_v33 = vadd.f32 %v958_v21, %v311_v9  ;;  %v1079_v40 = vadd.f32 %v1078_v28, %v425_v15  ;;  %v1151_v60 = vadd.f32 %v1150_v48, %v493_v42  ;;  %v449_v9 = vld [vmem:[%s1577_s12 + $0xa30] sm:$0xff]  ;;  %v430_v18 = vld [vmem:[%s1577_s12 + $0x998] sm:$0xff]  ;;  %v383_v19 = vld [vmem:[%s1577_s12 + $0x820] sm:$0xff] }
  0x83   : > { %v1033_v13 = vadd.f32 %v1032_v1, %v381_v59  ;;  %v450_v21 = vld [vmem:[%s1577_s12 + $0xa38] sm:$0xff]  ;;  %v431_v23 = vld [vmem:[%s1577_s12 + $0x9a0] sm:$0xff]  ;;  %v432_v29 = vld [vmem:[%s1577_s12 + $0x9a8] sm:$0xff] }
  0x84   : > { %v1008_v32 = vadd.f32 %v1007_v20, %v358_v3  ;;  %v960_v45 = vadd.f32 %v959_v33, %v312_v27  ;;  %v1080_v52 = vadd.f32 %v1079_v40, %v426_v34  ;;  %v1103_v3 = vadd.f32 %v1102_v55, %v447_v49  ;;  %v318_v22 = vld [vmem:[%s1577_s12 + $0x618] sm:$0xff]  ;;  %v384_v30 = vld [vmem:[%s1577_s12 + $0x828] sm:$0xff]  ;;  %v319_v33 = vld [vmem:[%s1577_s12 + $0x620] sm:$0xff] }
  0x85   : > { %v1152_v8 = vadd.f32 %v1151_v60, %v494_v54  ;;  %v1034_v25 = vadd.f32 %v1033_v13, %v382_v7  ;;  %v498_v36 = vld [vmem:[%s1577_s12 + $0xbb8] sm:$0xff]  ;;  %v563_v38 = vld [vmem:[%s1577_s12 + $0xdc0] sm:$0xff]  ;;  %v385_v41 = vld [vmem:[%s1577_s12 + $0x830] sm:$0xff] }
  0x86   : > { %v1009_v44 = vadd.f32 %v1008_v32, %v359_v14  ;;  %v961_v57 = vadd.f32 %v960_v45, %v313_v39  ;;  %v1081_v0 = vadd.f32 %v1080_v52, %v427_v46  ;;  %v496_v14 = vld [vmem:[%s1577_s12 + $0xba8] sm:$0xff]  ;;  %v1104_v15 = vadd.f32 %v1103_v3, %v448_v61  ;;  %v451_v32 = vld [vmem:[%s1577_s12 + $0xa40] sm:$0xff]  ;;  %v433_v53 = vld [vmem:[%s1577_s12 + $0x9b0] sm:$0xff] }
  0x87   : > { %v1153_v20 = vadd.f32 %v1152_v8, %v495_v2  ;;  %v1035_v35 = vadd.f32 %v1034_v25, %v383_v19  ;;  %v564_v39 = vld [vmem:[%s1577_s12 + $0xdc8] sm:$0xff]  ;;  %v499_v49 = vld [vmem:[%s1577_s12 + $0xbc0] sm:$0xff]  ;;  %v386_v54 = vld [vmem:[%s1577_s12 + $0x838] sm:$0xff] }
  0x88   : > { %v1010_v56 = vadd.f32 %v1009_v44, %v360_v26  ;;  %v962_v5 = vadd.f32 %v961_v57, %v314_v51  ;;  %v1082_v12 = vadd.f32 %v1081_v0, %v428_v58  ;;  %v497_v26 = vld [vmem:[%s1577_s12 + $0xbb0] sm:$0xff]  ;;  %v1105_v27 = vadd.f32 %v1104_v15, %v449_v9  ;;  %v452_v43 = vld [vmem:[%s1577_s12 + $0xa48] sm:$0xff]  ;;  %v566_v51 = vld [vmem:[%s1577_s12 + $0xdd8] sm:$0xff] }
  0x89   : > { %v1154_v31 = vadd.f32 %v1153_v20, %v496_v14  ;;  %v565_v44 = vld [vmem:[%s1577_s12 + $0xdd0] sm:$0xff]  ;;  %v1226_v45 = vadd.f32 %v564_v39, %v563_v38  ;;  %v320_v46 = vld [vmem:[%s1577_s12 + $0x628] sm:$0xff]  ;;  %v1036_v48 = vadd.f32 %v1035_v35, %v384_v30  ;;  %v322_v58 = vld [vmem:[%s1577_s12 + $0x638] sm:$0xff] }
  0x8a   : > { %v1011_v4 = vadd.f32 %v1010_v56, %v361_v50  ;;  %v963_v17 = vadd.f32 %v962_v5, %v315_v63  ;;  %v1083_v24 = vadd.f32 %v1082_v12, %v429_v6  ;;  %v1106_v37 = vadd.f32 %v1105_v27, %v450_v21  ;;  %v453_v56 = vld [vmem:[%s1577_s12 + $0xa50] sm:$0xff]  ;;  %v500_v61 = vld [vmem:[%s1577_s12 + $0xbc8] sm:$0xff]  ;;  %v567_v63 = vld [vmem:[%s1577_s12 + $0xde0] sm:$0xff] }
  0x8b   : > { %v1155_v42 = vadd.f32 %v1154_v31, %v497_v26  ;;  %v1227_v57 = vadd.f32 %v1226_v45, %v565_v44  ;;  %v1037_v60 = vadd.f32 %v1036_v48, %v385_v41  ;;  %v434_v1 = vld [vmem:[%s1577_s12 + $0x9b8] sm:$0xff]  ;;  %v387_v2 = vld [vmem:[%s1577_s12 + $0x840] sm:$0xff]  ;;  %v321_v6 = vld [vmem:[%s1577_s12 + $0x630] sm:$0xff] }
  0x8c   : > { %v1013_v16 = vadd.f32 %v1012_v62, %v1011_v4  ;;  %v964_v28 = vadd.f32 %v963_v17, %v316_v10  ;;  %v1084_v34 = vadd.f32 %v1083_v24, %v430_v18  ;;  %v1107_v50 = vadd.f32 %v1106_v37, %v451_v32  ;;  %v454_v4 = vld [vmem:[%s1577_s12 + $0xa58] sm:$0xff]  ;;  %v501_v9 = vld [vmem:[%s1577_s12 + $0xbd0] sm:$0xff]  ;;  %v435_v13 = vld [vmem:[%s1577_s12 + $0x9c0] sm:$0xff] }
  0x8d   : > { %v1156_v55 = vadd.f32 %v1155_v42, %v498_v36  ;;  %v1228_v5 = vadd.f32 %v1227_v57, %v566_v51  ;;  %v1038_v8 = vadd.f32 %v1037_v60, %v386_v54  ;;  %v388_v14 = vld [vmem:[%s1577_s12 + $0x848] sm:$0xff]  ;;  %v970_v18 = vsel %vm801_vm0, %v322_v58, 0.0  ;;  %v502_v21 = vld [vmem:[%s1577_s12 + $0xbd8] sm:$0xff]  ;;  %v389_v26 = vld [vmem:[%s1577_s12 + $0x850] sm:$0xff] }
  0x8e   : > { %1014 = vadd.xlane.f32.xlu1 %v1013_v16  ;;  %v965_v40 = vadd.f32 %v964_v28, %v317_v11  ;;  %v1085_v47 = vadd.f32 %v1084_v34, %v431_v23  ;;  %v1108_v62 = vadd.f32 %v1107_v50, %v452_v43  ;;  %v568_v11 = vld [vmem:[%s1577_s12 + $0xde8] sm:$0xff]  ;;  %v455_v16 = vld [vmem:[%s1577_s12 + $0xa60] sm:$0xff]  ;;  %v569_v23 = vld [vmem:[%s1577_s12 + $0xdf0] sm:$0xff] }
  0x8f   : > { %v1157_v3 = vadd.f32 %v1156_v55, %v499_v49  ;;  %v1229_v17 = vadd.f32 %v1228_v5, %v567_v63  ;;  %v1039_v20 = vadd.f32 %v1038_v8, %v387_v2  ;;  %v436_v25 = vld [vmem:[%s1577_s12 + $0x9c8] sm:$0xff]  ;;  %v437_v30 = vld [vmem:[%s1577_s12 + $0x9d0] sm:$0xff]  ;;  %v570_v35 = vld [vmem:[%s1577_s12 + $0xdf8] sm:$0xff] }
  0x90   : > { %v966_v52 = vadd.f32 %v965_v40, %v318_v22  ;;  %v1086_v59 = vadd.f32 %v1085_v47, %v432_v29  ;;  %v1109_v10 = vadd.f32 %v1108_v62, %v453_v56  ;;  %v456_v28 = vld [vmem:[%s1577_s12 + $0xa68] sm:$0xff]  ;;  %v438_v37 = vld [vmem:[%s1577_s12 + $0x9d8] sm:$0xff]  ;;  %v457_v40 = vld [vmem:[%s1577_s12 + $0xa70] sm:$0xff] }
  0x91   : > { %v1158_v15 = vadd.f32 %v1157_v3, %v500_v61  ;;  %v1230_v29 = vadd.f32 %v1229_v17, %v568_v11  ;;  %v1040_v32 = vadd.f32 %v1039_v20, %v388_v14  ;;  %v390_v38 = vld [vmem:[%s1577_s12 + $0x858] sm:$0xff]  ;;  %v391_v43 = vld [vmem:[%s1577_s12 + $0x860] sm:$0xff]  ;;  %v504_v45 = vld [vmem:[%s1577_s12 + $0xbe8] sm:$0xff] }
  0x92   : > { %v967_v0 = vadd.f32 %v966_v52, %v319_v33  ;;  %v1087_v7 = vadd.f32 %v1086_v59, %v433_v53  ;;  %v1110_v22 = vadd.f32 %v1109_v10, %v454_v4  ;;  %v503_v33 = vld [vmem:[%s1577_s12 + $0xbe0] sm:$0xff]  ;;  %v505_v49 = vld [vmem:[%s1577_s12 + $0xbf0] sm:$0xff]  ;;  %v458_v51 = vld [vmem:[%s1577_s12 + $0xa78] sm:$0xff] }
  0x93   : > { %v1159_v27 = vadd.f32 %v1158_v15, %v501_v9  ;;  %v1231_v41 = vadd.f32 %v1230_v29, %v569_v23  ;;  %v1041_v44 = vadd.f32 %v1040_v32, %v389_v26  ;;  %v571_v47 = vld [vmem:[%s1577_s12 + $0xe00] sm:$0xff]  ;;  %v572_v57 = vld [vmem:[%s1577_s12 + $0xe08] sm:$0xff]  ;;  %v525_v59 = vld [vmem:[%s1577_s12 + $0xc90] sm:$0xff] }
  0x94   : > { %v968_v12 = vadd.f32 %v967_v0, %v320_v46  ;;  %v1088_v19 = vadd.f32 %v1087_v7, %v434_v1  ;;  %v1111_v34 = vadd.f32 %v1110_v22, %v455_v16  ;;  %v439_v48 = vld [vmem:[%s1577_s12 + $0x9e0] sm:$0xff]  ;;  %v524_v58 = vld [vmem:[%s1577_s12 + $0xc88] sm:$0xff]  ;;  %v506_v4 = vld [vmem:[%s1577_s12 + $0xbf8] sm:$0xff] }
  0x95   : > { %v1160_v39 = vadd.f32 %v1159_v27, %v502_v21  ;;  %v1232_v52 = vadd.f32 %v1231_v41, %v570_v35  ;;  %v523_v53 = vld [vmem:[%s1577_s12 + $0xc80] sm:$0xff]  ;;  %v1042_v55 = vadd.f32 %v1041_v44, %v390_v38  ;;  %v440_v60 = vld [vmem:[%s1577_s12 + $0x9e8] sm:$0xff]  ;;  %v526_v7 = vld [vmem:[%s1577_s12 + $0xc98] sm:$0xff] }
  0x96   : > { %v969_v24 = vadd.f32 %v968_v12, %v321_v6  ;;  %v1089_v31 = vadd.f32 %v1088_v19, %v435_v13  ;;  %v1112_v46 = vadd.f32 %v1111_v34, %v456_v28  ;;  %v392_v61 = vld [vmem:[%s1577_s12 + $0x868] sm:$0xff]  ;;  %v459_v63 = vld [vmem:[%s1577_s12 + $0xa80] sm:$0xff]  ;;  %v1184_v1 = vadd.f32 %v524_v58, %v523_v53  ;;  %v573_v6 = vld [vmem:[%s1577_s12 + $0xe10] sm:$0xff] }
  0x97   : > { %v1161_v50 = vadd.f32 %v1160_v39, %v503_v33  ;;  %v1233_v0 = vadd.f32 %v1232_v52, %v571_v47  ;;  %v1043_v3 = vadd.f32 %v1042_v55, %v391_v43  ;;  %v442_v8 = vld [vmem:[%s1577_s12 + $0x9f8] sm:$0xff]  ;;  %v393_v9 = vld [vmem:[%s1577_s12 + $0x870] sm:$0xff]  ;;  %v460_v11 = vld [vmem:[%s1577_s12 + $0xa88] sm:$0xff] }
  0x98   : > { %v971_v36 = vadd.f32 %v970_v18, %v969_v24  ;;  %v1090_v42 = vadd.f32 %v1089_v31, %v436_v25  ;;  %v1113_v56 = vadd.f32 %v1112_v46, %v457_v40  ;;  %v1185_v13 = vadd.f32 %v1184_v1, %v525_v59  ;;  %v507_v16 = vld [vmem:[%s1577_s12 + $0xc00] sm:$0xff]  ;;  %v574_v18 = vld [vmem:[%s1577_s12 + $0xe18] sm:$0xff]  ;;  %v441_v20 = vld [vmem:[%s1577_s12 + $0x9f0] sm:$0xff] }
  0x99   : > { %v1162_v62 = vadd.f32 %v1161_v50, %v504_v45  ;;  %v1234_v12 = vadd.f32 %v1233_v0, %v572_v57  ;;  %v1044_v15 = vadd.f32 %v1043_v3, %v392_v61  ;;  %v527_v19 = vld [vmem:[%s1577_s12 + $0xca0] sm:$0xff]  ;;  %v394_v21 = vld [vmem:[%s1577_s12 + $0x878] sm:$0xff]  ;;  %v461_v23 = vld [vmem:[%s1577_s12 + $0xa90] sm:$0xff]  ;;  %v1096_v32 = vsel %vm801_vm0, %v442_v8, 0.0 }
  0x9a   : > { %972 = vadd.xlane.f32.xlu0 %v971_v36  ;;  %v1091_v54 = vadd.f32 %v1090_v42, %v437_v30  ;;  %v1114_v5 = vadd.f32 %v1113_v56, %v458_v51  ;;  %v1186_v25 = vadd.f32 %v1185_v13, %v526_v7  ;;  %v508_v28 = vld [vmem:[%s1577_s12 + $0xc08] sm:$0xff]  ;;  %v575_v30 = vld [vmem:[%s1577_s12 + $0xe20] sm:$0xff]  ;;  %v462_v35 = vld [vmem:[%s1577_s12 + $0xa98] sm:$0xff] }
  0x9b   : > { %v1163_v10 = vadd.f32 %v1162_v62, %v505_v49  ;;  %v1235_v24 = vadd.f32 %v1234_v12, %v573_v6  ;;  %v1045_v27 = vadd.f32 %v1044_v15, %v393_v9  ;;  %v528_v31 = vld [vmem:[%s1577_s12 + $0xca8] sm:$0xff]  ;;  %v395_v33 = vld [vmem:[%s1577_s12 + $0x880] sm:$0xff]  ;;  %v509_v40 = vld [vmem:[%s1577_s12 + $0xc10] sm:$0xff] }
  0x9c   : > { %v1092_v2 = vadd.f32 %v1091_v54, %v438_v37  ;;  %v1115_v17 = vadd.f32 %v1114_v5, %v459_v63  ;;  %v1187_v37 = vadd.f32 %v1186_v25, %v527_v19  ;;  %v576_v42 = vld [vmem:[%s1577_s12 + $0xe28] sm:$0xff]  ;;  %v529_v43 = vld [vmem:[%s1577_s12 + $0xcb0] sm:$0xff]  ;;  %v463_v47 = vld [vmem:[%s1577_s12 + $0xaa0] sm:$0xff] }
  0x9d   : > { %v1164_v22 = vadd.f32 %v1163_v10, %v506_v4  ;;  %v1236_v36 = vadd.f32 %v1235_v24, %v574_v18  ;;  %v1046_v39 = vadd.f32 %v1045_v27, %v394_v21  ;;  %v396_v44 = vld [vmem:[%s1577_s12 + $0x888] sm:$0xff]  ;;  %v397_v45 = vld [vmem:[%s1577_s12 + $0x890] sm:$0xff]  ;;  %v510_v52 = vld [vmem:[%s1577_s12 + $0xc18] sm:$0xff] }
  0x9e   : > { %v1093_v14 = vadd.f32 %v1092_v2, %v439_v48  ;;  %v1116_v29 = vadd.f32 %v1115_v17, %v460_v11  ;;  %v1188_v49 = vadd.f32 %v1187_v37, %v528_v31  ;;  %v577_v54 = vld [vmem:[%s1577_s12 + $0xe30] sm:$0xff]  ;;  %v530_v55 = vld [vmem:[%s1577_s12 + $0xcb8] sm:$0xff]  ;;  %v511_v57 = vld [vmem:[%s1577_s12 + $0xc20] sm:$0xff] }
  0x9f   : > { %v1165_v34 = vadd.f32 %v1164_v22, %v507_v16  ;;  %v1237_v48 = vadd.f32 %v1236_v36, %v575_v30  ;;  %v1047_v51 = vadd.f32 %v1046_v39, %v395_v33  ;;  %v398_v56 = vld [vmem:[%s1577_s12 + $0x898] sm:$0xff]  ;;  %v464_v59 = vld [vmem:[%s1577_s12 + $0xaa8] sm:$0xff]  ;;  %v465_v63 = vld [vmem:[%s1577_s12 + $0xab0] sm:$0xff] }
  0xa0   : > { %v1094_v26 = vadd.f32 %v1093_v14, %v440_v60  ;;  %v1117_v41 = vadd.f32 %v1116_v29, %v461_v23  ;;  %v1189_v61 = vadd.f32 %v1188_v49, %v529_v43  ;;  %v578_v1 = vld [vmem:[%s1577_s12 + $0xe38] sm:$0xff]  ;;  %v531_v2 = vld [vmem:[%s1577_s12 + $0xcc0] sm:$0xff]  ;;  %v644_v8 = vld [vmem:[%s1577_s12 + $0x1048] sm:$0xff] }
  0xa1   : > { %v1166_v46 = vadd.f32 %v1165_v34, %v508_v28  ;;  %v1238_v60 = vadd.f32 %v1237_v48, %v576_v42  ;;  %v1048_v62 = vadd.f32 %v1047_v51, %v396_v44  ;;  %v399_v3 = vld [vmem:[%s1577_s12 + $0x8a0] sm:$0xff]  ;;  %v645_v9 = vld [vmem:[%s1577_s12 + $0x1050] sm:$0xff]  ;;  %v512_v11 = vld [vmem:[%s1577_s12 + $0xc28] sm:$0xff] }
  0xa2   : > { %v1095_v38 = vadd.f32 %v1094_v26, %v441_v20  ;;  %v1118_v53 = vadd.f32 %v1117_v41, %v462_v35  ;;  %v1190_v6 = vadd.f32 %v1189_v61, %v530_v55  ;;  %v643_v7 = vld [vmem:[%s1577_s12 + $0x1040] sm:$0xff]  ;;  %v532_v14 = vld [vmem:[%s1577_s12 + $0xcc8] sm:$0xff]  ;;  %v466_v18 = vld [vmem:[%s1577_s12 + $0xab8] sm:$0xff] }
  0xa3   : > { %v1167_v58 = vadd.f32 %v1166_v46, %v509_v40  ;;  %v1239_v5 = vadd.f32 %v1238_v60, %v577_v54  ;;  %v1049_v10 = vadd.f32 %v1048_v62, %v397_v45  ;;  %v579_v13 = vld [vmem:[%s1577_s12 + $0xe40] sm:$0xff]  ;;  %v1310_v15 = vadd.f32 %v644_v8, %v643_v7  ;;  %v400_v16 = vld [vmem:[%s1577_s12 + $0x8a8] sm:$0xff]  ;;  %v646_v21 = vld [vmem:[%s1577_s12 + $0x1058] sm:$0xff] }
  0xa4   : > { %v1097_v50 = vadd.f32 %v1096_v32, %v1095_v38  ;;  %v1119_v0 = vadd.f32 %v1118_v53, %v463_v47  ;;  %v1191_v20 = vadd.f32 %v1190_v6, %v531_v2  ;;  %v513_v23 = vld [vmem:[%s1577_s12 + $0xc30] sm:$0xff]  ;;  %v580_v25 = vld [vmem:[%s1577_s12 + $0xe48] sm:$0xff]  ;;  %v402_v28 = vld [vmem:[%s1577_s12 + $0x8b8] sm:$0xff] }
  0xa5   : > { %v1168_v4 = vadd.f32 %v1167_v58, %v510_v52  ;;  %v1240_v19 = vadd.f32 %v1239_v5, %v578_v1  ;;  %v1050_v22 = vadd.f32 %v1049_v10, %v398_v56  ;;  %v533_v26 = vld [vmem:[%s1577_s12 + $0xcd0] sm:$0xff]  ;;  %v1311_v27 = vadd.f32 %v1310_v15, %v645_v9  ;;  %v467_v30 = vld [vmem:[%s1577_s12 + $0xac0] sm:$0xff]  ;;  %v514_v35 = vld [vmem:[%s1577_s12 + $0xc38] sm:$0xff] }
  0xa6   : > { %1098 = vadd.xlane.f32.xlu1 %v1097_v50  ;;  %v1120_v12 = vadd.f32 %v1119_v0, %v464_v59  ;;  %v1192_v32 = vadd.f32 %v1191_v20, %v532_v14  ;;  %v647_v33 = vld [vmem:[%s1577_s12 + $0x1060] sm:$0xff]  ;;  %v581_v37 = vld [vmem:[%s1577_s12 + $0xe50] sm:$0xff]  ;;  %v534_v38 = vld [vmem:[%s1577_s12 + $0xcd8] sm:$0xff]  ;;  %v1054_v52 = vsel %vm801_vm0, %v402_v28, 0.0 }
  0xa7   : > { %v1169_v17 = vadd.f32 %v1168_v4, %v511_v57  ;;  %v1241_v31 = vadd.f32 %v1240_v19, %v579_v13  ;;  %v1051_v34 = vadd.f32 %v1050_v22, %v399_v3  ;;  %v1312_v39 = vadd.f32 %v1311_v27, %v646_v21  ;;  %v401_v40 = vld [vmem:[%s1577_s12 + $0x8b0] sm:$0xff]  ;;  %v468_v42 = vld [vmem:[%s1577_s12 + $0xac8] sm:$0xff]  ;;  %v515_v47 = vld [vmem:[%s1577_s12 + $0xc40] sm:$0xff] }
  0xa8   : > { %v1121_v24 = vadd.f32 %v1120_v12, %v465_v63  ;;  %v1193_v44 = vadd.f32 %v1192_v32, %v533_v26  ;;  %v648_v45 = vld [vmem:[%s1577_s12 + $0x1068] sm:$0xff]  ;;  %v582_v49 = vld [vmem:[%s1577_s12 + $0xe58] sm:$0xff]  ;;  %v535_v50 = vld [vmem:[%s1577_s12 + $0xce0] sm:$0xff] }
  0xa9   : > { %v1170_v29 = vadd.f32 %v1169_v17, %v512_v11  ;;  %v1242_v43 = vadd.f32 %v1241_v31, %v580_v25  ;;  %v1052_v46 = vadd.f32 %v1051_v34, %v400_v16  ;;  %v1313_v51 = vadd.f32 %v1312_v39, %v647_v33  ;;  %v469_v54 = vld [vmem:[%s1577_s12 + $0xad0] sm:$0xff]  ;;  %v516_v59 = vld [vmem:[%s1577_s12 + $0xc48] sm:$0xff]  ;;  %v583_v61 = vld [vmem:[%s1577_s12 + $0xe60] sm:$0xff] }
  0xaa   : > { %v1122_v36 = vadd.f32 %v1121_v24, %v466_v18  ;;  %v1194_v56 = vadd.f32 %v1193_v44, %v534_v38  ;;  %v649_v57 = vld [vmem:[%s1577_s12 + $0x1070] sm:$0xff]  ;;  %v536_v62 = vld [vmem:[%s1577_s12 + $0xce8] sm:$0xff]  ;;  %v470_v2 = vld [vmem:[%s1577_s12 + $0xad8] sm:$0xff] }
  0xab   : > { %v1171_v41 = vadd.f32 %v1170_v29, %v513_v23  ;;  %v1243_v55 = vadd.f32 %v1242_v43, %v581_v37  ;;  %v1053_v58 = vadd.f32 %v1052_v46, %v401_v40  ;;  %v1314_v63 = vadd.f32 %v1313_v51, %v648_v45  ;;  %v517_v0 = vld [vmem:[%s1577_s12 + $0xc50] sm:$0xff]  ;;  %v650_v5 = vld [vmem:[%s1577_s12 + $0x1078] sm:$0xff]  ;;  %v584_v9 = vld [vmem:[%s1577_s12 + $0xe68] sm:$0xff] }
  0xac   : > { %v1123_v48 = vadd.f32 %v1122_v36, %v467_v30  ;;  %v1195_v4 = vadd.f32 %v1194_v56, %v535_v50  ;;  %v518_v7 = vld [vmem:[%s1577_s12 + $0xc58] sm:$0xff]  ;;  %v537_v10 = vld [vmem:[%s1577_s12 + $0xcf0] sm:$0xff]  ;;  %v471_v13 = vld [vmem:[%s1577_s12 + $0xae0] sm:$0xff] }
  0xad   : > { %v1172_v53 = vadd.f32 %v1171_v41, %v514_v35  ;;  %v1244_v3 = vadd.f32 %v1243_v55, %v582_v49  ;;  %v1055_v6 = vadd.f32 %v1054_v52, %v1053_v58  ;;  %v1315_v11 = vadd.f32 %v1314_v63, %v649_v57  ;;  %v585_v14 = vld [vmem:[%s1577_s12 + $0xe70] sm:$0xff]  ;;  %v651_v17 = vld [vmem:[%s1577_s12 + $0x1080] sm:$0xff]  ;;  %v538_v20 = vld [vmem:[%s1577_s12 + $0xcf8] sm:$0xff] }
  0xae   : > { %v1124_v60 = vadd.f32 %v1123_v48, %v468_v42  ;;  %v1196_v16 = vadd.f32 %v1195_v4, %v536_v62  ;;  %v519_v18 = vld [vmem:[%s1577_s12 + $0xc60] sm:$0xff]  ;;  %v604_v23 = vld [vmem:[%s1577_s12 + $0xf08] sm:$0xff]  ;;  %v605_v29 = vld [vmem:[%s1577_s12 + $0xf10] sm:$0xff] }
  0xaf   : > { %v1173_v1 = vadd.f32 %v1172_v53, %v515_v47  ;;  %v1245_v15 = vadd.f32 %v1244_v3, %v583_v61  ;;  %1056 = vadd.xlane.f32.xlu0 %v1055_v6  ;;  %v1316_v21 = vadd.f32 %v1315_v11, %v650_v5  ;;  %v603_v22 = vld [vmem:[%s1577_s12 + $0xf00] sm:$0xff]  ;;  %v472_v25 = vld [vmem:[%s1577_s12 + $0xae8] sm:$0xff]  ;;  %v586_v32 = vld [vmem:[%s1577_s12 + $0xe78] sm:$0xff] }
  0xb0   : > { %v1125_v8 = vadd.f32 %v1124_v60, %v469_v54  ;;  %v1197_v27 = vadd.f32 %v1196_v16, %v537_v10  ;;  %v652_v28 = vld [vmem:[%s1577_s12 + $0x1088] sm:$0xff]  ;;  %v539_v33 = vld [vmem:[%s1577_s12 + $0xd00] sm:$0xff]  ;;  %v1268_v35 = vadd.f32 %v604_v23, %v603_v22  ;;  %v473_v37 = vld [vmem:[%s1577_s12 + $0xaf0] sm:$0xff] }
  0xb1   : > { %v1174_v12 = vadd.f32 %v1173_v1, %v516_v59  ;;  %v1246_v26 = vadd.f32 %v1245_v15, %v584_v9  ;;  %v520_v30 = vld [vmem:[%s1577_s12 + $0xc68] sm:$0xff]  ;;  %v1317_v34 = vadd.f32 %v1316_v21, %v651_v17  ;;  %v653_v40 = vld [vmem:[%s1577_s12 + $0x1090] sm:$0xff]  ;;  %v606_v41 = vld [vmem:[%s1577_s12 + $0xf18] sm:$0xff] }
  0xb2   : > { %v1126_v19 = vadd.f32 %v1125_v8, %v470_v2  ;;  %v1198_v39 = vadd.f32 %v1197_v27, %v538_v20  ;;  %v522_v42 = vld [vmem:[%s1577_s12 + $0xc78] sm:$0xff]  ;;  %v587_v44 = vld [vmem:[%s1577_s12 + $0xe80] sm:$0xff]  ;;  %v540_v45 = vld [vmem:[%s1577_s12 + $0xd08] sm:$0xff]  ;;  %v1269_v47 = vadd.f32 %v1268_v35, %v605_v29 }
  0xb3   : > { %v1175_v24 = vadd.f32 %v1174_v12, %v517_v0  ;;  %v1247_v38 = vadd.f32 %v1246_v26, %v585_v14  ;;  %v1318_v46 = vadd.f32 %v1317_v34, %v652_v28  ;;  %v474_v49 = vld [vmem:[%s1577_s12 + $0xaf8] sm:$0xff]  ;;  %v607_v53 = vld [vmem:[%s1577_s12 + $0xf20] sm:$0xff]  ;;  %v521_v54 = vld [vmem:[%s1577_s12 + $0xc70] sm:$0xff]  ;;  %v1180_v2 = vsel %vm801_vm0, %v522_v42, 0.0 }
  0xb4   : > { %v1127_v31 = vadd.f32 %v1126_v19, %v471_v13  ;;  %v1199_v51 = vadd.f32 %v1198_v39, %v539_v33  ;;  %v654_v52 = vld [vmem:[%s1577_s12 + $0x1098] sm:$0xff]  ;;  %v588_v56 = vld [vmem:[%s1577_s12 + $0xe88] sm:$0xff]  ;;  %v541_v57 = vld [vmem:[%s1577_s12 + $0xd10] sm:$0xff]  ;;  %v1270_v59 = vadd.f32 %v1269_v47, %v606_v41 }
  0xb5   : > { %v1176_v36 = vadd.f32 %v1175_v24, %v518_v7  ;;  %v1248_v50 = vadd.f32 %v1247_v38, %v586_v32  ;;  %v1319_v58 = vadd.f32 %v1318_v46, %v653_v40  ;;  %v475_v61 = vld [vmem:[%s1577_s12 + $0xb00] sm:$0xff]  ;;  %v608_v1 = vld [vmem:[%s1577_s12 + $0xf28] sm:$0xff]  ;;  %v589_v4 = vld [vmem:[%s1577_s12 + $0xe90] sm:$0xff] }
  0xb6   : > { %v1128_v43 = vadd.f32 %v1127_v31, %v472_v25  ;;  %v1200_v63 = vadd.f32 %v1199_v51, %v540_v45  ;;  %v655_v0 = vld [vmem:[%s1577_s12 + $0x10a0] sm:$0xff]  ;;  %v542_v5 = vld [vmem:[%s1577_s12 + $0xd18] sm:$0xff]  ;;  %v1271_v7 = vadd.f32 %v1270_v59, %v607_v53  ;;  %v476_v9 = vld [vmem:[%s1577_s12 + $0xb08] sm:$0xff] }
  0xb7   : > { %v1177_v48 = vadd.f32 %v1176_v36, %v519_v18  ;;  %v1249_v62 = vadd.f32 %v1248_v50, %v587_v44  ;;  %v1320_v6 = vadd.f32 %v1319_v58, %v654_v52  ;;  %v656_v12 = vld [vmem:[%s1577_s12 + $0x10a8] sm:$0xff]  ;;  %v609_v13 = vld [vmem:[%s1577_s12 + $0xf30] sm:$0xff]  ;;  %v590_v16 = vld [vmem:[%s1577_s12 + $0xe98] sm:$0xff] }
  0xb8   : > { %v1129_v55 = vadd.f32 %v1128_v43, %v473_v37  ;;  %v1201_v11 = vadd.f32 %v1200_v63, %v541_v57  ;;  %v477_v14 = vld [vmem:[%s1577_s12 + $0xb10] sm:$0xff]  ;;  %v543_v17 = vld [vmem:[%s1577_s12 + $0xd20] sm:$0xff]  ;;  %v1272_v19 = vadd.f32 %v1271_v7, %v608_v1  ;;  %v478_v21 = vld [vmem:[%s1577_s12 + $0xb18] sm:$0xff] }
  0xb9   : > { %v1178_v60 = vadd.f32 %v1177_v48, %v520_v30  ;;  %v1250_v10 = vadd.f32 %v1249_v62, %v588_v56  ;;  %v1321_v18 = vadd.f32 %v1320_v6, %v655_v0  ;;  %v657_v24 = vld [vmem:[%s1577_s12 + $0x10b0] sm:$0xff]  ;;  %v610_v25 = vld [vmem:[%s1577_s12 + $0xf38] sm:$0xff]  ;;  %v591_v27 = vld [vmem:[%s1577_s12 + $0xea0] sm:$0xff] }
  0xba   : > { %v1130_v3 = vadd.f32 %v1129_v55, %v474_v49  ;;  %v1202_v23 = vadd.f32 %v1201_v11, %v542_v5  ;;  %v592_v28 = vld [vmem:[%s1577_s12 + $0xea8] sm:$0xff]  ;;  %v1273_v31 = vadd.f32 %v1272_v19, %v609_v13  ;;  %v479_v32 = vld [vmem:[%s1577_s12 + $0xb20] sm:$0xff]  ;;  %v658_v35 = vld [vmem:[%s1577_s12 + $0x10b8] sm:$0xff] }
  0xbb   : > { %v1179_v8 = vadd.f32 %v1178_v60, %v521_v54  ;;  %v1251_v22 = vadd.f32 %v1250_v10, %v589_v4  ;;  %v544_v29 = vld [vmem:[%s1577_s12 + $0xd28] sm:$0xff]  ;;  %v1322_v30 = vadd.f32 %v1321_v18, %v656_v12  ;;  %v611_v36 = vld [vmem:[%s1577_s12 + $0xf40] sm:$0xff]  ;;  %v545_v39 = vld [vmem:[%s1577_s12 + $0xd30] sm:$0xff] }
  0xbc   : > { %v1131_v15 = vadd.f32 %v1130_v3, %v475_v61  ;;  %v1203_v34 = vadd.f32 %v1202_v23, %v543_v17  ;;  %v723_v37 = vld [vmem:[%s1577_s12 + $0x12c0] sm:$0xff]  ;;  %v1274_v41 = vadd.f32 %v1273_v31, %v610_v25  ;;  %v724_v42 = vld [vmem:[%s1577_s12 + $0x12c8] sm:$0xff]  ;;  %v725_v43 = vld [vmem:[%s1577_s12 + $0x12d0] sm:$0xff] }
  0xbd   : > { %v1181_v20 = vadd.f32 %v1180_v2, %v1179_v8  ;;  %v1252_v33 = vadd.f32 %v1251_v22, %v590_v16  ;;  %v1323_v40 = vadd.f32 %v1322_v30, %v657_v24  ;;  %v480_v44 = vld [vmem:[%s1577_s12 + $0xb28] sm:$0xff]  ;;  %v659_v47 = vld [vmem:[%s1577_s12 + $0x10c0] sm:$0xff]  ;;  %v1394_v49 = vadd.f32 %v724_v42, %v723_v37  ;;  %v593_v51 = vld [vmem:[%s1577_s12 + $0xeb0] sm:$0xff] }
  0xbe   : > { %v1132_v26 = vadd.f32 %v1131_v15, %v476_v9  ;;  %v1204_v46 = vadd.f32 %v1203_v34, %v544_v29  ;;  %v612_v48 = vld [vmem:[%s1577_s12 + $0xf48] sm:$0xff]  ;;  %v546_v52 = vld [vmem:[%s1577_s12 + $0xd38] sm:$0xff]  ;;  %v1275_v54 = vadd.f32 %v1274_v41, %v611_v36  ;;  %v613_v60 = vld [vmem:[%s1577_s12 + $0xf50] sm:$0xff] }
  0xbf   : > { %1182 = vadd.xlane.f32.xlu1 %v1181_v20  ;;  %v1253_v45 = vadd.f32 %v1252_v33, %v591_v27  ;;  %v1324_v53 = vadd.f32 %v1323_v40, %v658_v35  ;;  %v726_v55 = vld [vmem:[%s1577_s12 + $0x12d8] sm:$0xff]  ;;  %v660_v59 = vld [vmem:[%s1577_s12 + $0x10c8] sm:$0xff]  ;;  %v1395_v61 = vadd.f32 %v1394_v49, %v725_v43  ;;  %v547_v0 = vld [vmem:[%s1577_s12 + $0xd40] sm:$0xff] }
  0xc0   : > { %v1133_v38 = vadd.f32 %v1132_v26, %v477_v14  ;;  %v482_v56 = vld [vmem:[%s1577_s12 + $0xb38] sm:$0xff]  ;;  %v1205_v58 = vadd.f32 %v1204_v46, %v545_v39  ;;  %v1276_v2 = vadd.f32 %v1275_v54, %v612_v48  ;;  %v727_v3 = vld [vmem:[%s1577_s12 + $0x12e0] sm:$0xff]  ;;  %v481_v4 = vld [vmem:[%s1577_s12 + $0xb30] sm:$0xff] }
  0xc1   : > { %v1254_v57 = vadd.f32 %v1253_v45, %v592_v28  ;;  %v594_v63 = vld [vmem:[%s1577_s12 + $0xeb8] sm:$0xff]  ;;  %v1325_v1 = vadd.f32 %v1324_v53, %v659_v47  ;;  %v661_v7 = vld [vmem:[%s1577_s12 + $0x10d0] sm:$0xff]  ;;  %v1396_v9 = vadd.f32 %v1395_v61, %v726_v55  ;;  %v595_v11 = vld [vmem:[%s1577_s12 + $0xec0] sm:$0xff]  ;;  %v1138_v16 = vsel %vm801_vm0, %v482_v56, 0.0 }
  0xc2   : > { %v1134_v50 = vadd.f32 %v1133_v38, %v478_v21  ;;  %v1206_v6 = vadd.f32 %v1205_v58, %v546_v52  ;;  %v614_v8 = vld [vmem:[%s1577_s12 + $0xf58] sm:$0xff]  ;;  %v548_v12 = vld [vmem:[%s1577_s12 + $0xd48] sm:$0xff]  ;;  %v1277_v14 = vadd.f32 %v1276_v2, %v613_v60  ;;  %v615_v20 = vld [vmem:[%s1577_s12 + $0xf60] sm:$0xff] }
  0xc3   : > { %v1255_v5 = vadd.f32 %v1254_v57, %v593_v51  ;;  %v1326_v13 = vadd.f32 %v1325_v1, %v660_v59  ;;  %v728_v15 = vld [vmem:[%s1577_s12 + $0x12e8] sm:$0xff]  ;;  %v662_v19 = vld [vmem:[%s1577_s12 + $0x10d8] sm:$0xff]  ;;  %v1397_v21 = vadd.f32 %v1396_v9, %v727_v3  ;;  %v549_v24 = vld [vmem:[%s1577_s12 + $0xd50] sm:$0xff] }
  0xc4   : > { %v1135_v62 = vadd.f32 %v1134_v50, %v479_v32  ;;  %v1207_v18 = vadd.f32 %v1206_v6, %v547_v0  ;;  %v596_v23 = vld [vmem:[%s1577_s12 + $0xec8] sm:$0xff]  ;;  %v1278_v26 = vadd.f32 %v1277_v14, %v614_v8  ;;  %v729_v27 = vld [vmem:[%s1577_s12 + $0x12f0] sm:$0xff]  ;;  %v663_v31 = vld [vmem:[%s1577_s12 + $0x10e0] sm:$0xff] }
  0xc5   : > { %v1256_v17 = vadd.f32 %v1255_v5, %v594_v63  ;;  %v1327_v25 = vadd.f32 %v1326_v13, %v661_v7  ;;  %v597_v28 = vld [vmem:[%s1577_s12 + $0xed0] sm:$0xff]  ;;  %v616_v32 = vld [vmem:[%s1577_s12 + $0xf68] sm:$0xff]  ;;  %v1398_v33 = vadd.f32 %v1397_v21, %v728_v15  ;;  %v598_v35 = vld [vmem:[%s1577_s12 + $0xed8] sm:$0xff] }
  0xc6   : > { %v1136_v10 = vadd.f32 %v1135_v62, %v480_v44  ;;  %v1208_v30 = vadd.f32 %v1207_v18, %v548_v12  ;;  %v550_v36 = vld [vmem:[%s1577_s12 + $0xd58] sm:$0xff]  ;;  %v1279_v38 = vadd.f32 %v1278_v26, %v615_v20  ;;  %v551_v41 = vld [vmem:[%s1577_s12 + $0xd60] sm:$0xff]  ;;  %v664_v43 = vld [vmem:[%s1577_s12 + $0x10e8] sm:$0xff] }
  0xc7   : > { %v1257_v29 = vadd.f32 %v1256_v17, %v595_v11  ;;  %v1328_v37 = vadd.f32 %v1327_v25, %v662_v19  ;;  %v730_v39 = vld [vmem:[%s1577_s12 + $0x12f8] sm:$0xff]  ;;  %v617_v44 = vld [vmem:[%s1577_s12 + $0xf70] sm:$0xff]  ;;  %v1399_v45 = vadd.f32 %v1398_v33, %v729_v27  ;;  %v599_v46 = vld [vmem:[%s1577_s12 + $0xee0] sm:$0xff] }
  0xc8   : > { %v1137_v22 = vadd.f32 %v1136_v10, %v481_v4  ;;  %v1209_v42 = vadd.f32 %v1208_v30, %v549_v24  ;;  %v665_v47 = vld [vmem:[%s1577_s12 + $0x10f0] sm:$0xff]  ;;  %v618_v49 = vld [vmem:[%s1577_s12 + $0xf78] sm:$0xff]  ;;  %v1280_v50 = vadd.f32 %v1279_v38, %v616_v32  ;;  %v731_v51 = vld [vmem:[%s1577_s12 + $0x1300] sm:$0xff] }
  0xc9   : > { %v1258_v40 = vadd.f32 %v1257_v29, %v596_v23  ;;  %v1329_v48 = vadd.f32 %v1328_v37, %v663_v31  ;;  %v1400_v54 = vadd.f32 %v1399_v45, %v730_v39  ;;  %v683_v55 = vld [vmem:[%s1577_s12 + $0x1180] sm:$0xff]  ;;  %v684_v56 = vld [vmem:[%s1577_s12 + $0x1188] sm:$0xff]  ;;  %v685_v57 = vld [vmem:[%s1577_s12 + $0x1190] sm:$0xff] }
  0xca   : > { %v1139_v34 = vadd.f32 %v1138_v16, %v1137_v22  ;;  %v1210_v53 = vadd.f32 %v1209_v42, %v550_v36  ;;  %v600_v58 = vld [vmem:[%s1577_s12 + $0xee8] sm:$0xff]  ;;  %v1281_v61 = vadd.f32 %v1280_v50, %v617_v44  ;;  %v1352_v63 = vadd.f32 %v684_v56, %v683_v55  ;;  %v666_v2 = vld [vmem:[%s1577_s12 + $0x10f8] sm:$0xff]  ;;  %v619_v3 = vld [vmem:[%s1577_s12 + $0xf80] sm:$0xff] }
  0xcb   : > { %v1259_v52 = vadd.f32 %v1258_v40, %v597_v28  ;;  %v552_v59 = vld [vmem:[%s1577_s12 + $0xd68] sm:$0xff]  ;;  %v1330_v60 = vadd.f32 %v1329_v48, %v664_v43  ;;  %v1401_v4 = vadd.f32 %v1400_v54, %v731_v51  ;;  %v686_v5 = vld [vmem:[%s1577_s12 + $0x1198] sm:$0xff]  ;;  %v553_v7 = vld [vmem:[%s1577_s12 + $0xd70] sm:$0xff] }
  0xcc   : > { %1140 = vadd.xlane.f32.xlu0 %v1139_v34  ;;  %v732_v62 = vld [vmem:[%s1577_s12 + $0x1308] sm:$0xff]  ;;  %v1211_v1 = vadd.f32 %v1210_v53, %v551_v41  ;;  %v602_v6 = vld [vmem:[%s1577_s12 + $0xef8] sm:$0xff]  ;;  %v1282_v9 = vadd.f32 %v1281_v61, %v618_v49  ;;  %v733_v10 = vld [vmem:[%s1577_s12 + $0x1310] sm:$0xff]  ;;  %v1353_v11 = vadd.f32 %v1352_v63, %v685_v57 }
  0xcd   : > { %v1260_v0 = vadd.f32 %v1259_v52, %v598_v35  ;;  %v1331_v8 = vadd.f32 %v1330_v60, %v665_v47  ;;  %v667_v14 = vld [vmem:[%s1577_s12 + $0x1100] sm:$0xff]  ;;  %v620_v15 = vld [vmem:[%s1577_s12 + $0xf88] sm:$0xff]  ;;  %v1402_v16 = vadd.f32 %v1401_v4, %v732_v62  ;;  %v601_v18 = vld [vmem:[%s1577_s12 + $0xef0] sm:$0xff]  ;;  %v1264_v30 = vsel %vm801_vm0, %v602_v6, 0.0 }
  0xce   : > { %v1212_v13 = vadd.f32 %v1211_v1, %v552_v59  ;;  %v687_v17 = vld [vmem:[%s1577_s12 + $0x11a0] sm:$0xff]  ;;  %v554_v19 = vld [vmem:[%s1577_s12 + $0xd78] sm:$0xff]  ;;  %v1283_v21 = vadd.f32 %v1282_v9, %v619_v3  ;;  %v1354_v23 = vadd.f32 %v1353_v11, %v686_v5  ;;  %v668_v26 = vld [vmem:[%s1577_s12 + $0x1108] sm:$0xff] }
  0xcf   : > { %v1261_v12 = vadd.f32 %v1260_v0, %v599_v46  ;;  %v1332_v20 = vadd.f32 %v1331_v8, %v666_v2  ;;  %v734_v22 = vld [vmem:[%s1577_s12 + $0x1318] sm:$0xff]  ;;  %v621_v27 = vld [vmem:[%s1577_s12 + $0xf90] sm:$0xff]  ;;  %v1403_v28 = vadd.f32 %v1402_v16, %v733_v10  ;;  %v688_v29 = vld [vmem:[%s1577_s12 + $0x11a8] sm:$0xff] }
  0xd0   : > { %v1213_v25 = vadd.f32 %v1212_v13, %v553_v7  ;;  %v555_v31 = vld [vmem:[%s1577_s12 + $0xd80] sm:$0xff]  ;;  %v1284_v33 = vadd.f32 %v1283_v21, %v620_v15  ;;  %v1355_v35 = vadd.f32 %v1354_v23, %v687_v17  ;;  %v669_v38 = vld [vmem:[%s1577_s12 + $0x1110] sm:$0xff]  ;;  %v622_v39 = vld [vmem:[%s1577_s12 + $0xf98] sm:$0xff] }
  0xd1   : > { %v1262_v24 = vadd.f32 %v1261_v12, %v600_v58  ;;  %v1333_v32 = vadd.f32 %v1332_v20, %v667_v14  ;;  %v735_v34 = vld [vmem:[%s1577_s12 + $0x1320] sm:$0xff]  ;;  %v1404_v40 = vadd.f32 %v1403_v28, %v734_v22  ;;  %v689_v41 = vld [vmem:[%s1577_s12 + $0x11b0] sm:$0xff]  ;;  %v556_v42 = vld [vmem:[%s1577_s12 + $0xd88] sm:$0xff] }
  0xd2   : > { %v1214_v37 = vadd.f32 %v1213_v25, %v554_v19  ;;  %v1285_v44 = vadd.f32 %v1284_v33, %v621_v27  ;;  %v736_v45 = vld [vmem:[%s1577_s12 + $0x1328] sm:$0xff]  ;;  %v1356_v46 = vadd.f32 %v1355_v35, %v688_v29  ;;  %v670_v49 = vld [vmem:[%s1577_s12 + $0x1118] sm:$0xff]  ;;  %v623_v50 = vld [vmem:[%s1577_s12 + $0xfa0] sm:$0xff] }
  0xd3   : > { %v1263_v36 = vadd.f32 %v1262_v24, %v601_v18  ;;  %v1334_v43 = vadd.f32 %v1333_v32, %v668_v26  ;;  %v1405_v51 = vadd.f32 %v1404_v40, %v735_v34  ;;  %v690_v52 = vld [vmem:[%s1577_s12 + $0x11b8] sm:$0xff]  ;;  %v557_v53 = vld [vmem:[%s1577_s12 + $0xd90] sm:$0xff]  ;;  %v671_v59 = vld [vmem:[%s1577_s12 + $0x1120] sm:$0xff] }
  0xd4   : > { %v1215_v48 = vadd.f32 %v1214_v37, %v555_v31  ;;  %v1286_v55 = vadd.f32 %v1285_v44, %v622_v39  ;;  %v737_v56 = vld [vmem:[%s1577_s12 + $0x1330] sm:$0xff]  ;;  %v1357_v57 = vadd.f32 %v1356_v46, %v689_v41  ;;  %v624_v60 = vld [vmem:[%s1577_s12 + $0xfa8] sm:$0xff]  ;;  %v691_v62 = vld [vmem:[%s1577_s12 + $0x11c0] sm:$0xff] }
  0xd5   : > { %v1265_v47 = vadd.f32 %v1264_v30, %v1263_v36  ;;  %v1335_v54 = vadd.f32 %v1334_v43, %v669_v38  ;;  %v1406_v61 = vadd.f32 %v1405_v51, %v736_v45  ;;  %v558_v63 = vld [vmem:[%s1577_s12 + $0xd98] sm:$0xff]  ;;  %v672_v5 = vld [vmem:[%s1577_s12 + $0x1128] sm:$0xff]  ;;  %v625_v6 = vld [vmem:[%s1577_s12 + $0xfb0] sm:$0xff] }
  0xd6   : > { %v1216_v58 = vadd.f32 %v1215_v48, %v556_v42  ;;  %v1287_v1 = vadd.f32 %v1286_v55, %v623_v50  ;;  %v738_v2 = vld [vmem:[%s1577_s12 + $0x1338] sm:$0xff]  ;;  %v1358_v3 = vadd.f32 %v1357_v57, %v690_v52  ;;  %v692_v8 = vld [vmem:[%s1577_s12 + $0x11c8] sm:$0xff]  ;;  %v559_v9 = vld [vmem:[%s1577_s12 + $0xda0] sm:$0xff] }
  0xd7   : > { %1266 = vadd.xlane.f32.xlu1 %v1265_v47  ;;  %v1336_v0 = vadd.f32 %v1335_v54, %v670_v49  ;;  %v1407_v7 = vadd.f32 %v1406_v61, %v737_v56  ;;  %v739_v12 = vld [vmem:[%s1577_s12 + $0x1340] sm:$0xff]  ;;  %v673_v15 = vld [vmem:[%s1577_s12 + $0x1130] sm:$0xff]  ;;  %v626_v16 = vld [vmem:[%s1577_s12 + $0xfb8] sm:$0xff] }
  0xd8   : > { %v1217_v4 = vadd.f32 %v1216_v58, %v557_v53  ;;  %v1288_v11 = vadd.f32 %v1287_v1, %v624_v60  ;;  %v1359_v13 = vadd.f32 %v1358_v3, %v691_v62  ;;  %v693_v18 = vld [vmem:[%s1577_s12 + $0x11d0] sm:$0xff]  ;;  %v560_v20 = vld [vmem:[%s1577_s12 + $0xda8] sm:$0xff]  ;;  %v562_v21 = vld [vmem:[%s1577_s12 + $0xdb8] sm:$0xff] }
  0xd9   : > { %v1337_v10 = vadd.f32 %v1336_v0, %v671_v59  ;;  %v1408_v17 = vadd.f32 %v1407_v7, %v738_v2  ;;  %v740_v24 = vld [vmem:[%s1577_s12 + $0x1348] sm:$0xff]  ;;  %v674_v28 = vld [vmem:[%s1577_s12 + $0x1138] sm:$0xff]  ;;  %v627_v29 = vld [vmem:[%s1577_s12 + $0xfc0] sm:$0xff]  ;;  %v1222_v42 = vsel %vm801_vm0, %v562_v21, 0.0 }
  0xda   : > { %v1218_v14 = vadd.f32 %v1217_v4, %v558_v63  ;;  %v1289_v23 = vadd.f32 %v1288_v11, %v625_v6  ;;  %v1360_v25 = vadd.f32 %v1359_v13, %v692_v8  ;;  %v694_v31 = vld [vmem:[%s1577_s12 + $0x11d8] sm:$0xff]  ;;  %v561_v32 = vld [vmem:[%s1577_s12 + $0xdb0] sm:$0xff]  ;;  %v675_v38 = vld [vmem:[%s1577_s12 + $0x1140] sm:$0xff] }
  0xdb   : > { %v1338_v22 = vadd.f32 %v1337_v10, %v672_v5  ;;  %v1409_v30 = vadd.f32 %v1408_v17, %v739_v12  ;;  %v741_v35 = vld [vmem:[%s1577_s12 + $0x1350] sm:$0xff]  ;;  %v628_v39 = vld [vmem:[%s1577_s12 + $0xfc8] sm:$0xff]  ;;  %v695_v41 = vld [vmem:[%s1577_s12 + $0x11e0] sm:$0xff] }
  0xdc   : > { %v1219_v27 = vadd.f32 %v1218_v14, %v559_v9  ;;  %v1290_v34 = vadd.f32 %v1289_v23, %v626_v16  ;;  %v1361_v36 = vadd.f32 %v1360_v25, %v693_v18  ;;  %v742_v45 = vld [vmem:[%s1577_s12 + $0x1358] sm:$0xff]  ;;  %v676_v48 = vld [vmem:[%s1577_s12 + $0x1148] sm:$0xff]  ;;  %v629_v49 = vld [vmem:[%s1577_s12 + $0xfd0] sm:$0xff] }
  0xdd   : > { %v1339_v33 = vadd.f32 %v1338_v22, %v673_v15  ;;  %v1410_v40 = vadd.f32 %v1409_v30, %v740_v24  ;;  %v696_v51 = vld [vmem:[%s1577_s12 + $0x11e8] sm:$0xff]  ;;  %v743_v54 = vld [vmem:[%s1577_s12 + $0x1360] sm:$0xff]  ;;  %v677_v57 = vld [vmem:[%s1577_s12 + $0x1150] sm:$0xff] }
  0xde   : > { %v1220_v37 = vadd.f32 %v1219_v27, %v560_v20  ;;  %v1291_v44 = vadd.f32 %v1290_v34, %v627_v29  ;;  %v1362_v46 = vadd.f32 %v1361_v36, %v694_v31  ;;  %v630_v58 = vld [vmem:[%s1577_s12 + $0xfd8] sm:$0xff]  ;;  %v697_v60 = vld [vmem:[%s1577_s12 + $0x11f0] sm:$0xff]  ;;  %v744_v63 = vld [vmem:[%s1577_s12 + $0x1368] sm:$0xff] }
  0xdf   : > { %v1340_v43 = vadd.f32 %v1339_v33, %v674_v28  ;;  %v1411_v50 = vadd.f32 %v1410_v40, %v741_v35  ;;  %v678_v1 = vld [vmem:[%s1577_s12 + $0x1158] sm:$0xff]  ;;  %v631_v2 = vld [vmem:[%s1577_s12 + $0xfe0] sm:$0xff]  ;;  %v745_v7 = vld [vmem:[%s1577_s12 + $0x1370] sm:$0xff] }
  0xe0   : > { %v1221_v47 = vadd.f32 %v1220_v37, %v561_v32  ;;  %v1292_v53 = vadd.f32 %v1291_v44, %v628_v39  ;;  %v1363_v55 = vadd.f32 %v1362_v46, %v695_v41  ;;  %v698_v4 = vld [vmem:[%s1577_s12 + $0x11f8] sm:$0xff]  ;;  %v679_v9 = vld [vmem:[%s1577_s12 + $0x1160] sm:$0xff]  ;;  %v632_v10 = vld [vmem:[%s1577_s12 + $0xfe8] sm:$0xff] }
  0xe1   : > { %v1341_v52 = vadd.f32 %v1340_v43, %v675_v38  ;;  %v1412_v59 = vadd.f32 %v1411_v50, %v742_v45  ;;  %v699_v12 = vld [vmem:[%s1577_s12 + $0x1200] sm:$0xff]  ;;  %v746_v15 = vld [vmem:[%s1577_s12 + $0x1378] sm:$0xff]  ;;  %v680_v18 = vld [vmem:[%s1577_s12 + $0x1168] sm:$0xff] }
  0xe2   : > { %v1223_v56 = vadd.f32 %v1222_v42, %v1221_v47  ;;  %v1293_v62 = vadd.f32 %v1292_v53, %v629_v49  ;;  %v1364_v0 = vadd.f32 %v1363_v55, %v696_v51  ;;  %v700_v21 = vld [vmem:[%s1577_s12 + $0x1208] sm:$0xff]  ;;  %v682_v23 = vld [vmem:[%s1577_s12 + $0x1178] sm:$0xff]  ;;  %v681_v28 = vld [vmem:[%s1577_s12 + $0x1170] sm:$0xff] }
  0xe3   : > { %v1342_v61 = vadd.f32 %v1341_v52, %v676_v48  ;;  %v1413_v3 = vadd.f32 %v1412_v59, %v743_v54  ;;  %v634_v29 = vld [vmem:[%s1577_s12 + $0xff8] sm:$0xff]  ;;  %v701_v31 = vld [vmem:[%s1577_s12 + $0x1210] sm:$0xff]  ;;  %v748_v34 = vld [vmem:[%s1577_s12 + $0x1388] sm:$0xff]  ;;  %v1348_v36 = vsel %vm801_vm0, %v682_v23, 0.0 }
  0xe4   : > { %1224 = vadd.xlane.f32.xlu0 %v1223_v56  ;;  %v1294_v6 = vadd.f32 %v1293_v62, %v630_v58  ;;  %v1365_v8 = vadd.f32 %v1364_v0, %v697_v60  ;;  %v635_v37 = vld [vmem:[%s1577_s12 + $0x1000] sm:$0xff]  ;;  %v702_v39 = vld [vmem:[%s1577_s12 + $0x1218] sm:$0xff]  ;;  %v749_v42 = vld [vmem:[%s1577_s12 + $0x1390] sm:$0xff] }
  0xe5   : > { %v1343_v5 = vadd.f32 %v1342_v61, %v677_v57  ;;  %v1414_v11 = vadd.f32 %v1413_v3, %v744_v63  ;;  %v636_v44 = vld [vmem:[%s1577_s12 + $0x1008] sm:$0xff]  ;;  %v703_v46 = vld [vmem:[%s1577_s12 + $0x1220] sm:$0xff]  ;;  %v750_v49 = vld [vmem:[%s1577_s12 + $0x1398] sm:$0xff] }
  0xe6   : > { %v1295_v14 = vadd.f32 %v1294_v6, %v631_v2  ;;  %v1366_v16 = vadd.f32 %v1365_v8, %v698_v4  ;;  %v637_v51 = vld [vmem:[%s1577_s12 + $0x1010] sm:$0xff]  ;;  %v704_v53 = vld [vmem:[%s1577_s12 + $0x1228] sm:$0xff]  ;;  %v751_v55 = vld [vmem:[%s1577_s12 + $0x13a0] sm:$0xff] }
  0xe7   : > { %v889_v19 = vpop.xlane.xlu1 %888  ;;  %v1344_v13 = vadd.f32 %v1343_v5, %v678_v1  ;;  %v1415_v20 = vadd.f32 %v1414_v11, %v745_v7  ;;  %v638_v57 = vld [vmem:[%s1577_s12 + $0x1018] sm:$0xff]  ;;  %v705_v59 = vld [vmem:[%s1577_s12 + $0x1230] sm:$0xff]  ;;  %v752_v61 = vld [vmem:[%s1577_s12 + $0x13a8] sm:$0xff] }
  0xe8   : > { %v1438_v26 = vmul.f32 0.0002, %v889_v19  ;;  %v633_v19 = vld [vmem:[%s1577_s12 + $0xff0] sm:$0xff]  ;;  %v1296_v25 = vadd.f32 %v1295_v14, %v632_v10  ;;  %v1367_v27 = vadd.f32 %v1366_v16, %v699_v12  ;;  %v639_v63 = vld [vmem:[%s1577_s12 + $0x1020] sm:$0xff]  ;;  %v706_v1 = vld [vmem:[%s1577_s12 + $0x1238] sm:$0xff] }
  0xe9   : > { %v1345_v24 = vadd.f32 %v1344_v13, %v679_v9  ;;  %v1416_v30 = vadd.f32 %v1415_v20, %v746_v15  ;;  %v753_v3 = vld [vmem:[%s1577_s12 + $0x13b0] sm:$0xff]  ;;  %v640_v6 = vld [vmem:[%s1577_s12 + $0x1028] sm:$0xff]  ;;  %v707_v8 = vld [vmem:[%s1577_s12 + $0x1240] sm:$0xff] }
  0xea   : > { %1455 = vst.msk [vmem:[%s2154_s16 + $0x10] sm:$0xff] %vm1452_vm1, %v1438_v26  ;;  %v747_v26 = vld [vmem:[%s1577_s12 + $0x1380] sm:$0xff]  ;;  %v1297_v33 = vadd.f32 %v1296_v25, %v633_v19  ;;  %v1368_v35 = vadd.f32 %v1367_v27, %v700_v21  ;;  %v642_v10 = vld [vmem:[%s1577_s12 + $0x1038] sm:$0xff]  ;;  %v641_v14 = vld [vmem:[%s1577_s12 + $0x1030] sm:$0xff] }
  0xeb   : > { %v1346_v32 = vadd.f32 %v1345_v24, %v680_v18  ;;  %v1417_v38 = vadd.f32 %v1416_v30, %v747_v26  ;;  %v754_v12 = vld [vmem:[%s1577_s12 + $0x13b8] sm:$0xff]  ;;  %v708_v16 = vld [vmem:[%s1577_s12 + $0x1248] sm:$0xff]  ;;  %v755_v18 = vld [vmem:[%s1577_s12 + $0x13c0] sm:$0xff]  ;;  %v1306_v20 = vsel %vm801_vm0, %v642_v10, 0.0 }
  0xec   : > { %v805_v17 = vpop.xlane.xlu0 %804  ;;  %v1298_v41 = vadd.f32 %v1297_v33, %v634_v29  ;;  %v1369_v43 = vadd.f32 %v1368_v35, %v701_v31  ;;  %v756_v24 = vld [vmem:[%s1577_s12 + $0x13c8] sm:$0xff]  ;;  %v710_v27 = vld [vmem:[%s1577_s12 + $0x1258] sm:$0xff]  ;;  %v757_v29 = vld [vmem:[%s1577_s12 + $0x13d0] sm:$0xff] }
  0xed   : > { %v1436_v22 = vmul.f32 0.0002, %v805_v17  ;;  %v1347_v40 = vadd.f32 %v1346_v32, %v681_v28  ;;  %v1418_v45 = vadd.f32 %v1417_v38, %v748_v34  ;;  %v711_v32 = vld [vmem:[%s1577_s12 + $0x1260] sm:$0xff]  ;;  %v758_v33 = vld [vmem:[%s1577_s12 + $0x13d8] sm:$0xff] }
  0xee   : > { %v1299_v48 = vadd.f32 %v1298_v41, %v635_v37  ;;  %v1370_v50 = vadd.f32 %v1369_v43, %v702_v39  ;;  %v759_v37 = vld [vmem:[%s1577_s12 + $0x13e0] sm:$0xff] }
  0xef   : > { %1453 = vst.msk [vmem:[%s2154_s16] sm:$0xff] %vm1452_vm1, %v1436_v22  ;;  %v1349_v47 = vadd.f32 %v1348_v36, %v1347_v40  ;;  %v1419_v52 = vadd.f32 %v1418_v45, %v749_v42  ;;  %v709_v22 = vld [vmem:[%s1577_s12 + $0x1250] sm:$0xff]  ;;  %v712_v36 = vld [vmem:[%s1577_s12 + $0x1268] sm:$0xff]  ;;  %v762_v45 = vld [vmem:[%s1577_s12 + $0x13f8] sm:$0xff] }
  0xf0   : > { %v1300_v54 = vadd.f32 %v1299_v48, %v636_v44  ;;  %v1371_v56 = vadd.f32 %v1370_v50, %v703_v46  ;;  %v713_v40 = vld [vmem:[%s1577_s12 + $0x1270] sm:$0xff]  ;;  %v760_v42 = vld [vmem:[%s1577_s12 + $0x13e8] sm:$0xff] }
  0xf1   : > { %1350 = vadd.xlane.f32.xlu1 %v1349_v47  ;;  %v1420_v58 = vadd.f32 %v1419_v52, %v750_v49  ;;  %v714_v47 = vld [vmem:[%s1577_s12 + $0x1278] sm:$0xff]  ;;  %v761_v48 = vld [vmem:[%s1577_s12 + $0x13f0] sm:$0xff]  ;;  %v1432_v52 = vsel %vm801_vm0, %v762_v45, 0.0 }
  0xf2   : > { %v1301_v60 = vadd.f32 %v1300_v54, %v637_v51  ;;  %v1372_v62 = vadd.f32 %v1371_v56, %v704_v53  ;;  %v715_v51 = vld [vmem:[%s1577_s12 + $0x1280] sm:$0xff] }
  0xf3   : > { %v1421_v0 = vadd.f32 %v1420_v58, %v751_v55  ;;  %v716_v55 = vld [vmem:[%s1577_s12 + $0x1288] sm:$0xff]  ;;  %v717_v58 = vld [vmem:[%s1577_s12 + $0x1290] sm:$0xff] }
  0xf4   : > { %v1302_v2 = vadd.f32 %v1301_v60, %v638_v57  ;;  %v1373_v4 = vadd.f32 %v1372_v62, %v705_v59  ;;  %v718_v60 = vld [vmem:[%s1577_s12 + $0x1298] sm:$0xff]  ;;  %v719_v62 = vld [vmem:[%s1577_s12 + $0x12a0] sm:$0xff] }
  0xf5   : > { %v1422_v7 = vadd.f32 %v1421_v0, %v752_v61 }
  0xf6   : > { %v1303_v11 = vadd.f32 %v1302_v2, %v639_v63  ;;  %v1374_v13 = vadd.f32 %v1373_v4, %v706_v1  ;;  %v720_v1 = vld [vmem:[%s1577_s12 + $0x12a8] sm:$0xff] }
  0xf7   : > { %v1423_v15 = vadd.f32 %v1422_v7, %v753_v3  ;;  %v722_v3 = vld [vmem:[%s1577_s12 + $0x12b8] sm:$0xff] }
  0xf8   : > { %v1304_v17 = vadd.f32 %v1303_v11, %v640_v6  ;;  %v1375_v19 = vadd.f32 %v1374_v13, %v707_v8  ;;  %v1390_v7 = vsel %vm801_vm0, %v722_v3, 0.0 }
  0xf9   : > { %v1424_v21 = vadd.f32 %v1423_v15, %v754_v12 }
  0xfa   : > { %v931_v5 = vpop.xlane.xlu1 %930  ;;  %v1305_v23 = vadd.f32 %v1304_v17, %v641_v14  ;;  %v1376_v25 = vadd.f32 %v1375_v19, %v708_v16 }
  0xfb   : > { %v1439_v9 = vmul.f32 0.0002, %v931_v5  ;;  %v1425_v26 = vadd.f32 %v1424_v21, %v755_v18  ;;  %v721_v5 = vld [vmem:[%s1577_s12 + $0x12b0] sm:$0xff] }
  0xfc   : > { %v1307_v28 = vadd.f32 %v1306_v20, %v1305_v23  ;;  %v1377_v30 = vadd.f32 %v1376_v25, %v709_v22 }
  0xfd   : > { %1456 = vst.msk [vmem:[%s2154_s16 + $0x18] sm:$0xff] %vm1452_vm1, %v1439_v9  ;;  %v1426_v31 = vadd.f32 %v1425_v26, %v756_v24 }
  0xfe   : > { %1308 = vadd.xlane.f32.xlu0 %v1307_v28  ;;  %v1378_v34 = vadd.f32 %v1377_v30, %v710_v27 }
  0xff   : > { %v1427_v35 = vadd.f32 %v1426_v31, %v757_v29 }
 0x100   : > { %v1379_v38 = vadd.f32 %v1378_v34, %v711_v32 }
 0x101   : > { %v1428_v39 = vadd.f32 %v1427_v35, %v758_v33 }
 0x102   : > { %v1380_v43 = vadd.f32 %v1379_v38, %v712_v36 }
 0x103   : > { %v1429_v46 = vadd.f32 %v1428_v39, %v759_v37 }
 0x104   : > { %v1381_v49 = vadd.f32 %v1380_v43, %v713_v40 }
 0x105   : > { %v1430_v50 = vadd.f32 %v1429_v46, %v760_v42 }
 0x106   : > { %v847_v41 = vpop.xlane.xlu0 %846  ;;  %v1382_v53 = vadd.f32 %v1381_v49, %v714_v47 }
 0x107   : > { %v1437_v44 = vmul.f32 0.0002, %v847_v41  ;;  %v1431_v54 = vadd.f32 %v1430_v50, %v761_v48 }
 0x108   : > { %v1383_v56 = vadd.f32 %v1382_v53, %v715_v51 }
 0x109   : > { %1454 = vst.msk [vmem:[%s2154_s16 + $0x8] sm:$0xff] %vm1452_vm1, %v1437_v44  ;;  %v1433_v57 = vadd.f32 %v1432_v52, %v1431_v54 }
 0x10a   : > { %v1384_v59 = vadd.f32 %v1383_v56, %v716_v55 }
 0x10b   : > { %1434 = vadd.xlane.f32.xlu1 %v1433_v57 }
 0x10c   : > { %v1385_v61 = vadd.f32 %v1384_v59, %v717_v58 }
 0x10e   : > { %v1386_v63 = vadd.f32 %v1385_v61, %v718_v60 }
 0x110   : > { %v1387_v4 = vadd.f32 %v1386_v63, %v719_v62 }
 0x112   : > { %v1388_v6 = vadd.f32 %v1387_v4, %v720_v1 }
 0x114   : > { %v1389_v8 = vadd.f32 %v1388_v6, %v721_v5 }
 0x116   : > { %v1391_v9 = vadd.f32 %v1390_v7, %v1389_v8 }
 0x117   : > { %v1015_v0 = vpop.xlane.xlu1 %1014 }
 0x118   : > { %v1441_v2 = vmul.f32 0.0002, %v1015_v0  ;;  %1392 = vadd.xlane.f32.xlu0 %v1391_v9 }
 0x11a   : > { %1458 = vst.msk [vmem:[%s2154_s16 + $0x28] sm:$0xff] %vm1452_vm1, %v1441_v2 }
 0x123   : > { %v973_v10 = vpop.xlane.xlu0 %972 }
 0x124   : > { %v1440_v11 = vmul.f32 0.0002, %v973_v10 }
 0x126   : > { %1457 = vst.msk [vmem:[%s2154_s16 + $0x20] sm:$0xff] %vm1452_vm1, %v1440_v11 }
 0x12f   : > { %v1099_v12 = vpop.xlane.xlu1 %1098 }
 0x130   : > { %v1443_v13 = vmul.f32 0.0002, %v1099_v12 }
 0x132   : > { %1460 = vst.msk [vmem:[%s2154_s16 + $0x38] sm:$0xff] %vm1452_vm1, %v1443_v13 }
 0x138   : > { %v1057_v14 = vpop.xlane.xlu0 %1056 }
 0x139   : > { %v1442_v15 = vmul.f32 0.0002, %v1057_v14 }
 0x13b   : > { %1459 = vst.msk [vmem:[%s2154_s16 + $0x30] sm:$0xff] %vm1452_vm1, %v1442_v15 }
 0x148   : > { %v1183_v16 = vpop.xlane.xlu1 %1182 }
 0x149   : > { %v1445_v17 = vmul.f32 0.0002, %v1183_v16 }
 0x14b   : > { %1462 = vst.msk [vmem:[%s2154_s16 + $0x48] sm:$0xff] %vm1452_vm1, %v1445_v17 }
 0x155   : > { %v1141_v18 = vpop.xlane.xlu0 %1140 }
 0x156   : > { %v1444_v19 = vmul.f32 0.0002, %v1141_v18 }
 0x158   : > { %1461 = vst.msk [vmem:[%s2154_s16 + $0x40] sm:$0xff] %vm1452_vm1, %v1444_v19 }
 0x160   : > { %v1267_v20 = vpop.xlane.xlu1 %1266 }
 0x161   : > { %v1447_v21 = vmul.f32 0.0002, %v1267_v20 }
 0x163   : > { %1464 = vst.msk [vmem:[%s2154_s16 + $0x58] sm:$0xff] %vm1452_vm1, %v1447_v21 }
 0x16d   : > { %v1225_v22 = vpop.xlane.xlu0 %1224 }
 0x16e   : > { %v1446_v23 = vmul.f32 0.0002, %v1225_v22 }
 0x170   : > { %1463 = vst.msk [vmem:[%s2154_s16 + $0x50] sm:$0xff] %vm1452_vm1, %v1446_v23 }
 0x17a   : > { %v1351_v24 = vpop.xlane.xlu1 %1350 }
 0x17b   : > { %v1449_v25 = vmul.f32 0.0002, %v1351_v24 }
 0x17d   : > { %1466 = vst.msk [vmem:[%s2154_s16 + $0x68] sm:$0xff] %vm1452_vm1, %v1449_v25 }
 0x187   : > { %v1309_v26 = vpop.xlane.xlu0 %1308 }
 0x188   : > { %v1448_v27 = vmul.f32 0.0002, %v1309_v26 }
 0x18a   : > { %1465 = vst.msk [vmem:[%s2154_s16 + $0x60] sm:$0xff] %vm1452_vm1, %v1448_v27 }
 0x194   : > { %v1435_v28 = vpop.xlane.xlu1 %1434 }
 0x195   : > { %v1451_v29 = vmul.f32 0.0002, %v1435_v28 }
 0x197   : > { %1468 = vst.msk [vmem:[%s2154_s16 + $0x78] sm:$0xff] %vm1452_vm1, %v1451_v29 }
 0x1a1   : > { %v1393_v30 = vpop.xlane.xlu0 %1392 }
 0x1a2   : > { %v1450_v31 = vmul.f32 0.0002, %v1393_v30 }
 0x1a4   : > { %1467 = vst.msk [vmem:[%s2154_s16 + $0x70] sm:$0xff] %vm1452_vm1, %v1450_v31 }
 0x1a5 PF: > { %s11_s6 = sadd.s32 1, %s1551_s6  }
 0x1a6   : > { %p8_p4 = scmp.ge.s32.totalorder %s11_s6, 4  }
 0x1a8   :  { %10 = sbr.rel (!%p8_p4) target bundleno = 1 (0x1), region = 54 }

</bundles_post_ra>
